<compile_context>
chip_gen: v7x
topology: tpu7x:2x2x1
jax: 0.10.0
libtpu: 0.0.40
codegen_flags: <defaults>
</compile_context>

<pallas_src>
import functools
import math

import jax
import jax.numpy as jnp
from jax.experimental import pallas as pl
from jax.experimental.pallas import tpu as pltpu

# ---------------- model config (small, consistent with ModelArgs scaled down) ----------------
BATCH = 2
SEQ = 16
DIM = 128          # args.dim
N_HEADS = 4        # args.n_heads
HEAD_DIM = DIM // N_HEADS
HIDDEN = 256       # args.hidden_dim (scaled down)
EPS = 1e-5         # args.norm_eps


def _layernorm(x, gamma, beta, eps):
    mu = jnp.mean(x, axis=-1, keepdims=True)
    var = jnp.mean((x - mu) ** 2, axis=-1, keepdims=True)
    return (x - mu) * jax.lax.rsqrt(var + eps) * gamma + beta


def _gelu_exact(x):
    # F.gelu default (exact, erf-based)
    return 0.5 * x * (1.0 + jax.lax.erf(x * (1.0 / math.sqrt(2.0))))


def transformer_block_kernel(
    x_ref, mask_add_ref, vec_ref,
    wqkv_ref, bqkv_ref,
    wo_h_ref,
    w1_ref, b1_ref, w2_ref,
    out_ref,
    *, n_heads: int, eps: float,
):
    f32 = jnp.float32
    bf16 = jnp.bfloat16

    B, S, D = x_ref.shape
    hd = D // n_heads

    x = x_ref[...].reshape(B * S, D)              # (BS, D) f32  (cheap: S multiple of 8)
    mask_add = mask_add_ref[...]                  # (S, S) additive mask (0 or -1e4)

    vec = vec_ref[...]                            # (6, D) packed small vectors
    an_g, an_b = vec[0:1], vec[1:2]
    fn_g, fn_b = vec[2:3], vec[3:4]
    bo, b2 = vec[4:5], vec[5:6]

    # ---- attention_norm (f32) ----
    xn_bf = _layernorm(x, an_g, an_b, eps).astype(bf16)

    # ---- fused QKV projection: one (BS, D) @ (D, 3D) matmul, f32 accumulation ----
    qkv = jnp.dot(xn_bf, wqkv_ref[...], preferred_element_type=f32) + bqkv_ref[...]
    # 128-lane-aligned slices, then split the leading dim back into (B, S, .)
    q_bf = qkv[:, 0 * D:1 * D].reshape(B, S, D).astype(bf16)   # already scaled by 1/sqrt(hd)
    k_bf = qkv[:, 1 * D:2 * D].reshape(B, S, D).astype(bf16)
    v_bf = qkv[:, 2 * D:3 * D].reshape(B, S, D).astype(bf16)

    # ---- per-head attention, batched over B; head-concat fused into output projection ----
    dn_qk = (((2,), (2,)), ((0,), (0,)))          # contract hd, batch over B -> (B, Sq, Sk)
    dn_pv = (((2,), (1,)), ((0,), (0,)))          # contract Sk, batch over B -> (B, Sq, hd)
    wo_heads = wo_h_ref[...]                      # (H, hd, D) bf16

    acc = jnp.zeros((B * S, D), f32)
    for h in range(n_heads):
        sl = slice(h * hd, (h + 1) * hd)
        s_h = jax.lax.dot_general(q_bf[:, :, sl], k_bf[:, :, sl],
                                  dimension_numbers=dn_qk,
                                  preferred_element_type=f32)           # (B, S, S)
        s_h = s_h + mask_add[None]
        m = jnp.max(s_h, axis=-1, keepdims=True)
        e = jnp.exp(s_h - m)
        p = e / jnp.sum(e, axis=-1, keepdims=True)                      # exact reciprocal
        o_h = jax.lax.dot_general(p.astype(bf16), v_bf[:, :, sl],
                                  dimension_numbers=dn_pv,
                                  preferred_element_type=f32)           # (B, S, hd)
        acc = acc + jnp.dot(o_h.reshape(B * S, hd).astype(bf16), wo_heads[h],
                            preferred_element_type=f32)                 # (BS, D)

    h_res = x + acc + bo                                                # residual 1

    # ---- ffn_norm + FeedForward: linear1 -> GELU (exact erf) -> linear2 ----
    hn_bf = _layernorm(h_res, fn_g, fn_b, eps).astype(bf16)
    ff = jnp.dot(hn_bf, w1_ref[...], preferred_element_type=f32) + b1_ref[...]
    ff = _gelu_exact(ff)
    ff = jnp.dot(ff.astype(bf16), w2_ref[...], preferred_element_type=f32) + b2

    out_ref[...] = (h_res + ff).reshape(B, S, D)                        # residual 2


def transformer_block(x, mask, params):
    B, S, D = x.shape
    HF = params["w1"].shape[0]
    nh, hd = N_HEADS, HEAD_DIM
    bf16 = jnp.bfloat16
    inv_sqrt_d = 1.0 / math.sqrt(hd)

    # nn.Linear stores (out, in); pre-transpose to (in, out) and cast to bf16. The softmax
    # scale is folded into w_q / b_q, and q|k|v weights/biases are fused into one array.
    wq_t = (params["wq"].T * inv_sqrt_d).astype(bf16)
    wk_t = params["wk"].T.astype(bf16)
    wv_t = params["wv"].T.astype(bf16)
    wqkv = jnp.concatenate([wq_t, wk_t, wv_t], axis=1)                  # (D, 3D) bf16
    bqkv = jnp.concatenate([params["bq"] * inv_sqrt_d,
                            params["bk"], params["bv"]], axis=1)        # (1, 3D) f32
    wo_heads = params["wo"].T.reshape(nh, hd, D).astype(bf16)           # (H, hd, D) bf16
    w1_t = params["w1"].T.astype(bf16)                                  # (D, HF)
    w2_t = params["w2"].T.astype(bf16)                                  # (HF, D)

    # Additive mask (0 where allowed, -1e4 where masked) and packed small vectors.
    mask_add = jnp.where(mask == 0, -10000.0, 0.0).astype(jnp.float32)  # (S, S)
    vec = jnp.concatenate([params["an_g"], params["an_b"],
                           params["fn_g"], params["fn_b"],
                           params["bo"], params["b2"]], axis=0)         # (6, D) f32

    kernel = functools.partial(transformer_block_kernel, n_heads=nh, eps=EPS)
    vmem = pl.BlockSpec(memory_space=pltpu.MemorySpace.VMEM)

    return pl.pallas_call(
        kernel,
        out_shape=jax.ShapeDtypeStruct((B, S, D), jnp.float32),
        in_specs=[vmem] * 9,
        out_specs=vmem,
    )(x, mask_add, vec, wqkv, bqkv, wo_heads, w1_t, params["b1"], w2_t)


def reference_block(x, mask, p):
    """Pure-JAX f32 reference mirroring the PyTorch forward."""
    def ln(t, g, b):
        mu = t.mean(-1, keepdims=True)
        var = ((t - mu) ** 2).mean(-1, keepdims=True)
        return (t - mu) / jnp.sqrt(var + EPS) * g + b

    B, S, D = x.shape
    xn = ln(x, p["an_g"], p["an_b"])
    q = xn @ p["wq"].T + p["bq"]
    k = xn @ p["wk"].T + p["bk"]
    v = xn @ p["wv"].T + p["bv"]
    q = q.reshape(B, S, N_HEADS, HEAD_DIM).transpose(0, 2, 1, 3)
    k = k.reshape(B, S, N_HEADS, HEAD_DIM).transpose(0, 2, 1, 3)
    v = v.reshape(B, S, N_HEADS, HEAD_DIM).transpose(0, 2, 1, 3)
    score = jnp.einsum("bhqd,bhkd->bhqk", q, k) / math.sqrt(HEAD_DIM)
    score = jnp.where(mask[None, None] == 0, -10000.0, score)
    score = jax.nn.softmax(score, axis=-1)
    o = jnp.einsum("bhqk,bhkd->bhqd", score, v)
    o = o.transpose(0, 2, 1, 3).reshape(B, S, D)
    o = o @ p["wo"].T + p["bo"]
    h = x + o
    hn = ln(h, p["fn_g"], p["fn_b"])
    ff = hn @ p["w1"].T + p["b1"]
    ff = 0.5 * ff * (1.0 + jax.lax.erf(ff / math.sqrt(2.0)))
    ff = ff @ p["w2"].T + p["b2"]
    return h + ff


def init_params(key):
    ks = jax.random.split(key, 8)
    scale = 0.02
    return {
        "an_g": jnp.ones((1, DIM), jnp.float32),
        "an_b": jnp.zeros((1, DIM), jnp.float32),
        "wq": scale * jax.random.normal(ks[0], (DIM, DIM), jnp.float32),
        "bq": jnp.zeros((1, DIM), jnp.float32),
        "wk": scale * jax.random.normal(ks[1], (DIM, DIM), jnp.float32),
        "bk": jnp.zeros((1, DIM), jnp.float32),
        "wv": scale * jax.random.normal(ks[2], (DIM, DIM), jnp.float32),
        "bv": jnp.zeros((1, DIM), jnp.float32),
        "wo": scale * jax.random.normal(ks[3], (DIM, DIM), jnp.float32),
        "bo": jnp.zeros((1, DIM), jnp.float32),
        "fn_g": jnp.ones((1, DIM), jnp.float32),
        "fn_b": jnp.zeros((1, DIM), jnp.float32),
        "w1": scale * jax.random.normal(ks[4], (HIDDEN, DIM), jnp.float32),
        "b1": 0.01 * jax.random.normal(ks[5], (1, HIDDEN), jnp.float32),
        "w2": scale * jax.random.normal(ks[6], (DIM, HIDDEN), jnp.float32),
        "b2": 0.01 * jax.random.normal(ks[7], (1, DIM), jnp.float32),
    }


if __name__ == "__main__":
    key = jax.random.PRNGKey(0)
    kx, kp = jax.random.split(key)

    x = jax.random.normal(kx, (BATCH, SEQ, DIM), jnp.float32)
    mask = jnp.ones((SEQ, SEQ), jnp.float32)   # all-ones == mask=None semantics
    params = init_params(kp)

    out = transformer_block(x, mask, params)
    out = jax.block_until_ready(out)

    ref = reference_block(x, mask, params)
    assert out.shape == (BATCH, SEQ, DIM)
    # bf16 matmul inputs in the kernel -> slightly looser tolerance than pure f32.
    assert jnp.allclose(out, ref, atol=2e-2, rtol=2e-2), float(jnp.max(jnp.abs(out - ref)))

    print("KERNEL_OK")
</pallas_src>

<mosaic_0001>
module attributes {stable_mosaic.version = 11 : i64} {
  func.func @transformer_block_kernel(%arg0: memref<2x16x128xf32, #tpu.memory_space<vmem>>, %arg1: memref<16x16xf32, #tpu.memory_space<vmem>>, %arg2: memref<6x128xf32, #tpu.memory_space<vmem>>, %arg3: memref<128x384xbf16, #tpu.memory_space<vmem>>, %arg4: memref<1x384xf32, #tpu.memory_space<vmem>>, %arg5: memref<4x32x128xbf16, #tpu.memory_space<vmem>>, %arg6: memref<128x256xbf16, #tpu.memory_space<vmem>>, %arg7: memref<1x256xf32, #tpu.memory_space<vmem>>, %arg8: memref<256x128xbf16, #tpu.memory_space<vmem>>, %arg9: memref<2x16x128xf32, #tpu.memory_space<vmem>>) attributes {dimension_semantics = [], scalar_prefetch = 0 : i64, scratch_operands = 0 : i64, tpu.core_type = #tpu.core_type<tc>} {
    %c0 = arith.constant 0 : index
    %c0_0 = arith.constant 0 : index
    %c0_1 = arith.constant 0 : index
    %0 = vector.load %arg0[%c0, %c0_0, %c0_1] : memref<2x16x128xf32, #tpu.memory_space<vmem>>, vector<2x16x128xf32>
    %1 = vector.shape_cast %0 : vector<2x16x128xf32> to vector<32x128xf32>
    %c0_2 = arith.constant 0 : index
    %c0_3 = arith.constant 0 : index
    %2 = vector.load %arg1[%c0_2, %c0_3] : memref<16x16xf32, #tpu.memory_space<vmem>>, vector<16x16xf32>
    %c0_4 = arith.constant 0 : index
    %c0_5 = arith.constant 0 : index
    %3 = vector.load %arg2[%c0_4, %c0_5] : memref<6x128xf32, #tpu.memory_space<vmem>>, vector<6x128xf32>
    %4 = vector.extract_strided_slice %3 {offsets = [0, 0], sizes = [1, 128], strides = [1, 1]} : vector<6x128xf32> to vector<1x128xf32>
    %5 = vector.extract_strided_slice %3 {offsets = [1, 0], sizes = [1, 128], strides = [1, 1]} : vector<6x128xf32> to vector<1x128xf32>
    %6 = vector.extract_strided_slice %3 {offsets = [2, 0], sizes = [1, 128], strides = [1, 1]} : vector<6x128xf32> to vector<1x128xf32>
    %7 = vector.extract_strided_slice %3 {offsets = [3, 0], sizes = [1, 128], strides = [1, 1]} : vector<6x128xf32> to vector<1x128xf32>
    %8 = vector.extract_strided_slice %3 {offsets = [4, 0], sizes = [1, 128], strides = [1, 1]} : vector<6x128xf32> to vector<1x128xf32>
    %9 = vector.extract_strided_slice %3 {offsets = [5, 0], sizes = [1, 128], strides = [1, 1]} : vector<6x128xf32> to vector<1x128xf32>
    %cst = arith.constant dense<0.000000e+00> : vector<32xf32>
    %10 = vector.multi_reduction <add>, %1, %cst [1] : vector<32x128xf32> to vector<32xf32>
    %11 = vector.shape_cast %10 : vector<32xf32> to vector<32x1xf32>
    %cst_6 = arith.constant 1.280000e+02 : f32
    %12 = vector.broadcast %cst_6 : f32 to vector<32x1xf32>
    %13 = arith.divf %11, %12 : vector<32x1xf32>
    %14 = vector.broadcast %13 : vector<32x1xf32> to vector<32x128xf32>
    %15 = arith.subf %1, %14 : vector<32x128xf32>
    %16 = arith.mulf %15, %15 : vector<32x128xf32>
    %cst_7 = arith.constant dense<0.000000e+00> : vector<32xf32>
    %17 = vector.multi_reduction <add>, %16, %cst_7 [1] : vector<32x128xf32> to vector<32xf32>
    %18 = vector.shape_cast %17 : vector<32xf32> to vector<32x1xf32>
    %cst_8 = arith.constant 1.280000e+02 : f32
    %19 = vector.broadcast %cst_8 : f32 to vector<32x1xf32>
    %20 = arith.divf %18, %19 : vector<32x1xf32>
    %21 = vector.broadcast %13 : vector<32x1xf32> to vector<32x128xf32>
    %22 = arith.subf %1, %21 : vector<32x128xf32>
    %cst_9 = arith.constant 9.99999974E-6 : f32
    %23 = vector.broadcast %cst_9 : f32 to vector<32x1xf32>
    %24 = arith.addf %20, %23 : vector<32x1xf32>
    %25 = math.rsqrt %24 : vector<32x1xf32>
    %26 = vector.broadcast %25 : vector<32x1xf32> to vector<32x128xf32>
    %27 = arith.mulf %22, %26 : vector<32x128xf32>
    %28 = vector.broadcast %4 : vector<1x128xf32> to vector<32x128xf32>
    %29 = arith.mulf %27, %28 : vector<32x128xf32>
    %30 = vector.broadcast %5 : vector<1x128xf32> to vector<32x128xf32>
    %31 = arith.addf %29, %30 : vector<32x128xf32>
    %32 = arith.truncf %31 : vector<32x128xf32> to vector<32x128xbf16>
    %c0_10 = arith.constant 0 : index
    %c0_11 = arith.constant 0 : index
    %33 = vector.load %arg3[%c0_10, %c0_11] : memref<128x384xbf16, #tpu.memory_space<vmem>>, vector<128x384xbf16>
    %cst_12 = arith.constant dense<0.000000e+00> : vector<32x384xf32>
    %34 = tpu.matmul %32, %33, %cst_12 {dimension_numbers = #tpu.dot_dimension_numbers<[1], [0], [0], [1], [0, 0, 1, 1], [], []>} : vector<32x128xbf16>, vector<128x384xbf16>, vector<32x384xf32> -> vector<32x384xf32>
    %c0_13 = arith.constant 0 : index
    %c0_14 = arith.constant 0 : index
    %35 = vector.load %arg4[%c0_13, %c0_14] : memref<1x384xf32, #tpu.memory_space<vmem>>, vector<1x384xf32>
    %36 = vector.broadcast %35 : vector<1x384xf32> to vector<32x384xf32>
    %37 = arith.addf %34, %36 : vector<32x384xf32>
    %38 = vector.extract_strided_slice %37 {offsets = [0, 0], sizes = [32, 128], strides = [1, 1]} : vector<32x384xf32> to vector<32x128xf32>
    %39 = vector.shape_cast %38 : vector<32x128xf32> to vector<2x16x128xf32>
    %40 = arith.truncf %39 : vector<2x16x128xf32> to vector<2x16x128xbf16>
    %41 = vector.extract_strided_slice %37 {offsets = [0, 128], sizes = [32, 128], strides = [1, 1]} : vector<32x384xf32> to vector<32x128xf32>
    %42 = vector.shape_cast %41 : vector<32x128xf32> to vector<2x16x128xf32>
    %43 = arith.truncf %42 : vector<2x16x128xf32> to vector<2x16x128xbf16>
    %44 = vector.extract_strided_slice %37 {offsets = [0, 256], sizes = [32, 128], strides = [1, 1]} : vector<32x384xf32> to vector<32x128xf32>
    %45 = vector.shape_cast %44 : vector<32x128xf32> to vector<2x16x128xf32>
    %46 = arith.truncf %45 : vector<2x16x128xf32> to vector<2x16x128xbf16>
    %c0_15 = arith.constant 0 : index
    %c0_16 = arith.constant 0 : index
    %c0_17 = arith.constant 0 : index
    %47 = vector.load %arg5[%c0_15, %c0_16, %c0_17] : memref<4x32x128xbf16, #tpu.memory_space<vmem>>, vector<4x32x128xbf16>
    %cst_18 = arith.constant 0.000000e+00 : f32
    %48 = vector.broadcast %cst_18 : f32 to vector<32x128xf32>
    %49 = vector.extract_strided_slice %40 {offsets = [0, 0, 0], sizes = [2, 16, 32], strides = [1, 1, 1]} : vector<2x16x128xbf16> to vector<2x16x32xbf16>
    %50 = vector.extract_strided_slice %43 {offsets = [0, 0, 0], sizes = [2, 16, 32], strides = [1, 1, 1]} : vector<2x16x128xbf16> to vector<2x16x32xbf16>
    %cst_19 = arith.constant dense<0.000000e+00> : vector<2x16x16xf32>
    %51 = tpu.matmul %49, %50, %cst_19 {dimension_numbers = #tpu.dot_dimension_numbers<[2], [2], [1], [1], [0, 0, 0, 1, 1, 1], [0], [0]>} : vector<2x16x32xbf16>, vector<2x16x32xbf16>, vector<2x16x16xf32> -> vector<2x16x16xf32>
    %52 = vector.shape_cast %2 : vector<16x16xf32> to vector<1x16x16xf32>
    %53 = vector.broadcast %52 : vector<1x16x16xf32> to vector<2x16x16xf32>
    %54 = arith.addf %51, %53 : vector<2x16x16xf32>
    %cst_20 = arith.constant dense<0xFF800000> : vector<2x16xf32>
    %55 = vector.multi_reduction <maximumf>, %54, %cst_20 [2] : vector<2x16x16xf32> to vector<2x16xf32>
    %56 = vector.shape_cast %55 : vector<2x16xf32> to vector<2x16x1xf32>
    %57 = vector.broadcast %56 : vector<2x16x1xf32> to vector<2x16x16xf32>
    %58 = arith.subf %54, %57 : vector<2x16x16xf32>
    %59 = math.exp %58 : vector<2x16x16xf32>
    %cst_21 = arith.constant dense<0.000000e+00> : vector<2x16xf32>
    %60 = vector.multi_reduction <add>, %59, %cst_21 [2] : vector<2x16x16xf32> to vector<2x16xf32>
    %61 = vector.shape_cast %60 : vector<2x16xf32> to vector<2x16x1xf32>
    %62 = vector.broadcast %61 : vector<2x16x1xf32> to vector<2x16x16xf32>
    %63 = arith.divf %59, %62 : vector<2x16x16xf32>
    %64 = arith.truncf %63 : vector<2x16x16xf32> to vector<2x16x16xbf16>
    %65 = vector.extract_strided_slice %46 {offsets = [0, 0, 0], sizes = [2, 16, 32], strides = [1, 1, 1]} : vector<2x16x128xbf16> to vector<2x16x32xbf16>
    %cst_22 = arith.constant dense<0.000000e+00> : vector<2x16x32xf32>
    %66 = tpu.matmul %64, %65, %cst_22 {dimension_numbers = #tpu.dot_dimension_numbers<[2], [1], [1], [2], [0, 0, 0, 1, 1, 2], [0], [0]>} : vector<2x16x16xbf16>, vector<2x16x32xbf16>, vector<2x16x32xf32> -> vector<2x16x32xf32>
    %67 = vector.shape_cast %66 : vector<2x16x32xf32> to vector<32x32xf32>
    %68 = arith.truncf %67 : vector<32x32xf32> to vector<32x32xbf16>
    %69 = vector.extract_strided_slice %47 {offsets = [0, 0, 0], sizes = [1, 32, 128], strides = [1, 1, 1]} : vector<4x32x128xbf16> to vector<1x32x128xbf16>
    %70 = vector.shape_cast %69 : vector<1x32x128xbf16> to vector<32x128xbf16>
    %cst_23 = arith.constant dense<0.000000e+00> : vector<32x128xf32>
    %71 = tpu.matmul %68, %70, %cst_23 {dimension_numbers = #tpu.dot_dimension_numbers<[1], [0], [0], [1], [0, 0, 1, 1], [], []>} : vector<32x32xbf16>, vector<32x128xbf16>, vector<32x128xf32> -> vector<32x128xf32>
    %72 = arith.addf %48, %71 : vector<32x128xf32>
    %73 = vector.extract_strided_slice %40 {offsets = [0, 0, 32], sizes = [2, 16, 32], strides = [1, 1, 1]} : vector<2x16x128xbf16> to vector<2x16x32xbf16>
    %74 = vector.extract_strided_slice %43 {offsets = [0, 0, 32], sizes = [2, 16, 32], strides = [1, 1, 1]} : vector<2x16x128xbf16> to vector<2x16x32xbf16>
    %cst_24 = arith.constant dense<0.000000e+00> : vector<2x16x16xf32>
    %75 = tpu.matmul %73, %74, %cst_24 {dimension_numbers = #tpu.dot_dimension_numbers<[2], [2], [1], [1], [0, 0, 0, 1, 1, 1], [0], [0]>} : vector<2x16x32xbf16>, vector<2x16x32xbf16>, vector<2x16x16xf32> -> vector<2x16x16xf32>
    %76 = vector.shape_cast %2 : vector<16x16xf32> to vector<1x16x16xf32>
    %77 = vector.broadcast %76 : vector<1x16x16xf32> to vector<2x16x16xf32>
    %78 = arith.addf %75, %77 : vector<2x16x16xf32>
    %cst_25 = arith.constant dense<0xFF800000> : vector<2x16xf32>
    %79 = vector.multi_reduction <maximumf>, %78, %cst_25 [2] : vector<2x16x16xf32> to vector<2x16xf32>
    %80 = vector.shape_cast %79 : vector<2x16xf32> to vector<2x16x1xf32>
    %81 = vector.broadcast %80 : vector<2x16x1xf32> to vector<2x16x16xf32>
    %82 = arith.subf %78, %81 : vector<2x16x16xf32>
    %83 = math.exp %82 : vector<2x16x16xf32>
    %cst_26 = arith.constant dense<0.000000e+00> : vector<2x16xf32>
    %84 = vector.multi_reduction <add>, %83, %cst_26 [2] : vector<2x16x16xf32> to vector<2x16xf32>
    %85 = vector.shape_cast %84 : vector<2x16xf32> to vector<2x16x1xf32>
    %86 = vector.broadcast %85 : vector<2x16x1xf32> to vector<2x16x16xf32>
    %87 = arith.divf %83, %86 : vector<2x16x16xf32>
    %88 = arith.truncf %87 : vector<2x16x16xf32> to vector<2x16x16xbf16>
    %89 = vector.extract_strided_slice %46 {offsets = [0, 0, 32], sizes = [2, 16, 32], strides = [1, 1, 1]} : vector<2x16x128xbf16> to vector<2x16x32xbf16>
    %cst_27 = arith.constant dense<0.000000e+00> : vector<2x16x32xf32>
    %90 = tpu.matmul %88, %89, %cst_27 {dimension_numbers = #tpu.dot_dimension_numbers<[2], [1], [1], [2], [0, 0, 0, 1, 1, 2], [0], [0]>} : vector<2x16x16xbf16>, vector<2x16x32xbf16>, vector<2x16x32xf32> -> vector<2x16x32xf32>
    %91 = vector.shape_cast %90 : vector<2x16x32xf32> to vector<32x32xf32>
    %92 = arith.truncf %91 : vector<32x32xf32> to vector<32x32xbf16>
    %93 = vector.extract_strided_slice %47 {offsets = [1, 0, 0], sizes = [1, 32, 128], strides = [1, 1, 1]} : vector<4x32x128xbf16> to vector<1x32x128xbf16>
    %94 = vector.shape_cast %93 : vector<1x32x128xbf16> to vector<32x128xbf16>
    %cst_28 = arith.constant dense<0.000000e+00> : vector<32x128xf32>
    %95 = tpu.matmul %92, %94, %cst_28 {dimension_numbers = #tpu.dot_dimension_numbers<[1], [0], [0], [1], [0, 0, 1, 1], [], []>} : vector<32x32xbf16>, vector<32x128xbf16>, vector<32x128xf32> -> vector<32x128xf32>
    %96 = arith.addf %72, %95 : vector<32x128xf32>
    %97 = vector.extract_strided_slice %40 {offsets = [0, 0, 64], sizes = [2, 16, 32], strides = [1, 1, 1]} : vector<2x16x128xbf16> to vector<2x16x32xbf16>
    %98 = vector.extract_strided_slice %43 {offsets = [0, 0, 64], sizes = [2, 16, 32], strides = [1, 1, 1]} : vector<2x16x128xbf16> to vector<2x16x32xbf16>
    %cst_29 = arith.constant dense<0.000000e+00> : vector<2x16x16xf32>
    %99 = tpu.matmul %97, %98, %cst_29 {dimension_numbers = #tpu.dot_dimension_numbers<[2], [2], [1], [1], [0, 0, 0, 1, 1, 1], [0], [0]>} : vector<2x16x32xbf16>, vector<2x16x32xbf16>, vector<2x16x16xf32> -> vector<2x16x16xf32>
    %100 = vector.shape_cast %2 : vector<16x16xf32> to vector<1x16x16xf32>
    %101 = vector.broadcast %100 : vector<1x16x16xf32> to vector<2x16x16xf32>
    %102 = arith.addf %99, %101 : vector<2x16x16xf32>
    %cst_30 = arith.constant dense<0xFF800000> : vector<2x16xf32>
    %103 = vector.multi_reduction <maximumf>, %102, %cst_30 [2] : vector<2x16x16xf32> to vector<2x16xf32>
    %104 = vector.shape_cast %103 : vector<2x16xf32> to vector<2x16x1xf32>
    %105 = vector.broadcast %104 : vector<2x16x1xf32> to vector<2x16x16xf32>
    %106 = arith.subf %102, %105 : vector<2x16x16xf32>
    %107 = math.exp %106 : vector<2x16x16xf32>
    %cst_31 = arith.constant dense<0.000000e+00> : vector<2x16xf32>
    %108 = vector.multi_reduction <add>, %107, %cst_31 [2] : vector<2x16x16xf32> to vector<2x16xf32>
    %109 = vector.shape_cast %108 : vector<2x16xf32> to vector<2x16x1xf32>
    %110 = vector.broadcast %109 : vector<2x16x1xf32> to vector<2x16x16xf32>
    %111 = arith.divf %107, %110 : vector<2x16x16xf32>
    %112 = arith.truncf %111 : vector<2x16x16xf32> to vector<2x16x16xbf16>
    %113 = vector.extract_strided_slice %46 {offsets = [0, 0, 64], sizes = [2, 16, 32], strides = [1, 1, 1]} : vector<2x16x128xbf16> to vector<2x16x32xbf16>
    %cst_32 = arith.constant dense<0.000000e+00> : vector<2x16x32xf32>
    %114 = tpu.matmul %112, %113, %cst_32 {dimension_numbers = #tpu.dot_dimension_numbers<[2], [1], [1], [2], [0, 0, 0, 1, 1, 2], [0], [0]>} : vector<2x16x16xbf16>, vector<2x16x32xbf16>, vector<2x16x32xf32> -> vector<2x16x32xf32>
    %115 = vector.shape_cast %114 : vector<2x16x32xf32> to vector<32x32xf32>
    %116 = arith.truncf %115 : vector<32x32xf32> to vector<32x32xbf16>
    %117 = vector.extract_strided_slice %47 {offsets = [2, 0, 0], sizes = [1, 32, 128], strides = [1, 1, 1]} : vector<4x32x128xbf16> to vector<1x32x128xbf16>
    %118 = vector.shape_cast %117 : vector<1x32x128xbf16> to vector<32x128xbf16>
    %cst_33 = arith.constant dense<0.000000e+00> : vector<32x128xf32>
    %119 = tpu.matmul %116, %118, %cst_33 {dimension_numbers = #tpu.dot_dimension_numbers<[1], [0], [0], [1], [0, 0, 1, 1], [], []>} : vector<32x32xbf16>, vector<32x128xbf16>, vector<32x128xf32> -> vector<32x128xf32>
    %120 = arith.addf %96, %119 : vector<32x128xf32>
    %121 = vector.extract_strided_slice %40 {offsets = [0, 0, 96], sizes = [2, 16, 32], strides = [1, 1, 1]} : vector<2x16x128xbf16> to vector<2x16x32xbf16>
    %122 = vector.extract_strided_slice %43 {offsets = [0, 0, 96], sizes = [2, 16, 32], strides = [1, 1, 1]} : vector<2x16x128xbf16> to vector<2x16x32xbf16>
    %cst_34 = arith.constant dense<0.000000e+00> : vector<2x16x16xf32>
    %123 = tpu.matmul %121, %122, %cst_34 {dimension_numbers = #tpu.dot_dimension_numbers<[2], [2], [1], [1], [0, 0, 0, 1, 1, 1], [0], [0]>} : vector<2x16x32xbf16>, vector<2x16x32xbf16>, vector<2x16x16xf32> -> vector<2x16x16xf32>
    %124 = vector.shape_cast %2 : vector<16x16xf32> to vector<1x16x16xf32>
    %125 = vector.broadcast %124 : vector<1x16x16xf32> to vector<2x16x16xf32>
    %126 = arith.addf %123, %125 : vector<2x16x16xf32>
    %cst_35 = arith.constant dense<0xFF800000> : vector<2x16xf32>
    %127 = vector.multi_reduction <maximumf>, %126, %cst_35 [2] : vector<2x16x16xf32> to vector<2x16xf32>
    %128 = vector.shape_cast %127 : vector<2x16xf32> to vector<2x16x1xf32>
    %129 = vector.broadcast %128 : vector<2x16x1xf32> to vector<2x16x16xf32>
    %130 = arith.subf %126, %129 : vector<2x16x16xf32>
    %131 = math.exp %130 : vector<2x16x16xf32>
    %cst_36 = arith.constant dense<0.000000e+00> : vector<2x16xf32>
    %132 = vector.multi_reduction <add>, %131, %cst_36 [2] : vector<2x16x16xf32> to vector<2x16xf32>
    %133 = vector.shape_cast %132 : vector<2x16xf32> to vector<2x16x1xf32>
    %134 = vector.broadcast %133 : vector<2x16x1xf32> to vector<2x16x16xf32>
    %135 = arith.divf %131, %134 : vector<2x16x16xf32>
    %136 = arith.truncf %135 : vector<2x16x16xf32> to vector<2x16x16xbf16>
    %137 = vector.extract_strided_slice %46 {offsets = [0, 0, 96], sizes = [2, 16, 32], strides = [1, 1, 1]} : vector<2x16x128xbf16> to vector<2x16x32xbf16>
    %cst_37 = arith.constant dense<0.000000e+00> : vector<2x16x32xf32>
    %138 = tpu.matmul %136, %137, %cst_37 {dimension_numbers = #tpu.dot_dimension_numbers<[2], [1], [1], [2], [0, 0, 0, 1, 1, 2], [0], [0]>} : vector<2x16x16xbf16>, vector<2x16x32xbf16>, vector<2x16x32xf32> -> vector<2x16x32xf32>
    %139 = vector.shape_cast %138 : vector<2x16x32xf32> to vector<32x32xf32>
    %140 = arith.truncf %139 : vector<32x32xf32> to vector<32x32xbf16>
    %141 = vector.extract_strided_slice %47 {offsets = [3, 0, 0], sizes = [1, 32, 128], strides = [1, 1, 1]} : vector<4x32x128xbf16> to vector<1x32x128xbf16>
    %142 = vector.shape_cast %141 : vector<1x32x128xbf16> to vector<32x128xbf16>
    %cst_38 = arith.constant dense<0.000000e+00> : vector<32x128xf32>
    %143 = tpu.matmul %140, %142, %cst_38 {dimension_numbers = #tpu.dot_dimension_numbers<[1], [0], [0], [1], [0, 0, 1, 1], [], []>} : vector<32x32xbf16>, vector<32x128xbf16>, vector<32x128xf32> -> vector<32x128xf32>
    %144 = arith.addf %120, %143 : vector<32x128xf32>
    %145 = arith.addf %1, %144 : vector<32x128xf32>
    %146 = vector.broadcast %8 : vector<1x128xf32> to vector<32x128xf32>
    %147 = arith.addf %145, %146 : vector<32x128xf32>
    %cst_39 = arith.constant dense<0.000000e+00> : vector<32xf32>
    %148 = vector.multi_reduction <add>, %147, %cst_39 [1] : vector<32x128xf32> to vector<32xf32>
    %149 = vector.shape_cast %148 : vector<32xf32> to vector<32x1xf32>
    %cst_40 = arith.constant 1.280000e+02 : f32
    %150 = vector.broadcast %cst_40 : f32 to vector<32x1xf32>
    %151 = arith.divf %149, %150 : vector<32x1xf32>
    %152 = vector.broadcast %151 : vector<32x1xf32> to vector<32x128xf32>
    %153 = arith.subf %147, %152 : vector<32x128xf32>
    %154 = arith.mulf %153, %153 : vector<32x128xf32>
    %cst_41 = arith.constant dense<0.000000e+00> : vector<32xf32>
    %155 = vector.multi_reduction <add>, %154, %cst_41 [1] : vector<32x128xf32> to vector<32xf32>
    %156 = vector.shape_cast %155 : vector<32xf32> to vector<32x1xf32>
    %cst_42 = arith.constant 1.280000e+02 : f32
    %157 = vector.broadcast %cst_42 : f32 to vector<32x1xf32>
    %158 = arith.divf %156, %157 : vector<32x1xf32>
    %159 = vector.broadcast %151 : vector<32x1xf32> to vector<32x128xf32>
    %160 = arith.subf %147, %159 : vector<32x128xf32>
    %cst_43 = arith.constant 9.99999974E-6 : f32
    %161 = vector.broadcast %cst_43 : f32 to vector<32x1xf32>
    %162 = arith.addf %158, %161 : vector<32x1xf32>
    %163 = math.rsqrt %162 : vector<32x1xf32>
    %164 = vector.broadcast %163 : vector<32x1xf32> to vector<32x128xf32>
    %165 = arith.mulf %160, %164 : vector<32x128xf32>
    %166 = vector.broadcast %6 : vector<1x128xf32> to vector<32x128xf32>
    %167 = arith.mulf %165, %166 : vector<32x128xf32>
    %168 = vector.broadcast %7 : vector<1x128xf32> to vector<32x128xf32>
    %169 = arith.addf %167, %168 : vector<32x128xf32>
    %170 = arith.truncf %169 : vector<32x128xf32> to vector<32x128xbf16>
    %c0_44 = arith.constant 0 : index
    %c0_45 = arith.constant 0 : index
    %171 = vector.load %arg6[%c0_44, %c0_45] : memref<128x256xbf16, #tpu.memory_space<vmem>>, vector<128x256xbf16>
    %cst_46 = arith.constant dense<0.000000e+00> : vector<32x256xf32>
    %172 = tpu.matmul %170, %171, %cst_46 {dimension_numbers = #tpu.dot_dimension_numbers<[1], [0], [0], [1], [0, 0, 1, 1], [], []>} : vector<32x128xbf16>, vector<128x256xbf16>, vector<32x256xf32> -> vector<32x256xf32>
    %c0_47 = arith.constant 0 : index
    %c0_48 = arith.constant 0 : index
    %173 = vector.load %arg7[%c0_47, %c0_48] : memref<1x256xf32, #tpu.memory_space<vmem>>, vector<1x256xf32>
    %174 = vector.broadcast %173 : vector<1x256xf32> to vector<32x256xf32>
    %175 = arith.addf %172, %174 : vector<32x256xf32>
    %cst_49 = arith.constant 5.000000e-01 : f32
    %176 = vector.broadcast %cst_49 : f32 to vector<32x256xf32>
    %177 = arith.mulf %176, %175 : vector<32x256xf32>
    %cst_50 = arith.constant 0.707106769 : f32
    %178 = vector.broadcast %cst_50 : f32 to vector<32x256xf32>
    %179 = arith.mulf %175, %178 : vector<32x256xf32>
    %180 = math.erf %179 : vector<32x256xf32>
    %cst_51 = arith.constant 1.000000e+00 : f32
    %181 = vector.broadcast %cst_51 : f32 to vector<32x256xf32>
    %182 = arith.addf %181, %180 : vector<32x256xf32>
    %183 = arith.mulf %177, %182 : vector<32x256xf32>
    %184 = arith.truncf %183 : vector<32x256xf32> to vector<32x256xbf16>
    %c0_52 = arith.constant 0 : index
    %c0_53 = arith.constant 0 : index
    %185 = vector.load %arg8[%c0_52, %c0_53] : memref<256x128xbf16, #tpu.memory_space<vmem>>, vector<256x128xbf16>
    %cst_54 = arith.constant dense<0.000000e+00> : vector<32x128xf32>
    %186 = tpu.matmul %184, %185, %cst_54 {dimension_numbers = #tpu.dot_dimension_numbers<[1], [0], [0], [1], [0, 0, 1, 1], [], []>} : vector<32x256xbf16>, vector<256x128xbf16>, vector<32x128xf32> -> vector<32x128xf32>
    %187 = vector.broadcast %9 : vector<1x128xf32> to vector<32x128xf32>
    %188 = arith.addf %186, %187 : vector<32x128xf32>
    %189 = arith.addf %147, %188 : vector<32x128xf32>
    %190 = vector.shape_cast %189 : vector<32x128xf32> to vector<2x16x128xf32>
    %c0_55 = arith.constant 0 : index
    %c0_56 = arith.constant 0 : index
    %c0_57 = arith.constant 0 : index
    %191 = vector.load %arg9[%c0_55, %c0_56, %c0_57] : memref<2x16x128xf32, #tpu.memory_space<vmem>>, vector<2x16x128xf32>
    tpu.vector_store %arg9[%c0_55, %c0_56, %c0_57], %190 {strides = array<i32>} : memref<2x16x128xf32, #tpu.memory_space<vmem>>, vector<2x16x128xf32>,
    return
  }
}

</mosaic_0001>

<bundles_post_ra>
// kernel: tpu_custom_call.1
= control target key start
LH: loop header
LB: loop body
LE: loop exit
PB: predicated region body
PF: predicated region fallthrough
CT: control target
= control target key end

     0   :  { %14 = vsyncpa [#allocation3], 0  ;;  %s3465_s0 = inlined_call_operand.hbm [shape: f32[2,16,128], index: 0, kind: input, shape index: {}]   ;;  %s3466_s1 = inlined_call_operand.hbm [shape: f32[16,16], index: 1, kind: input, shape index: {}]   ;;  %s3467_s2 = inlined_call_operand.hbm [shape: f32[6,128], index: 2, kind: input, shape index: {}]   ;;  %s3468_s3 = inlined_call_operand.hbm [shape: bf16[128,384], index: 3, kind: input, shape index: {}]   ;;  %s3469_s4 = inlined_call_operand.vmem [shape: f32[1,384], index: 4, kind: input, shape index: {}]   ;;  %s3470_s5 = inlined_call_operand.hbm [shape: bf16[4,32,128], index: 5, kind: input, shape index: {}]   ;;  %s3471_s6 = inlined_call_operand.hbm [shape: bf16[128,256], index: 6, kind: input, shape index: {}]   ;;  %s3472_s7 = inlined_call_operand.vmem [shape: f32[1,256], index: 7, kind: input, shape index: {}]   ;;  %s3473_s8 = inlined_call_operand.hbm [shape: bf16[256,128], index: 8, kind: input, shape index: {}]   ;;  %s3474_s9 = inlined_call_operand.hbm [shape: f32[2,16,128], index: 9, kind: output, shape index: {}]  }
   0x1   :  { %15 = vsyncpa [#allocation6], 0 }
   0x2   :  { %16 = vsyncpa [#allocation9], 0 }
   0x3   :  { %17 = vsyncpa [#allocation12], 0 }
   0x4   :  { %18 = vsyncpa [#allocation4], 0  ;;  %s2952_s30 = smov [#allocation5]   ;;  %s2953_s11 = smov [#allocation8]  }
   0x5   :  { %s36_s10 = sshll.u32 %s2952_s30, 4  ;;  %s58_s12 = sshll.u32 %s2953_s11, 4  ;;  %s37_s10 = int_to_ptr.vmem [resolvable:$true] %s36_s10  ;;  %s3021_s12 = int_to_ptr.vmem [resolvable:$true] %s58_s12 }
   0x6   :  { %s2766_s15 = scalar_lea.hbm %s3466_s1, 256 }
   0x7   :  { %p2767_p0 = scmp.ne.s32.totalorder %s3466_s1, %s2766_s15  ;;  %p2770_p1 = scmp.lt.u32.totalorder %s2766_s15, %s3466_s1 }
   0x9   :  { %p2772_p2 = pnand %p2770_p1, %p2767_p0 }
   0xb   :  { %2775 = shalt.err (!%p2772_p2)
}
   0xc   :  { %s2776_s20 = scalar_lea.vmem %s37_s10, 256  ;;  %p2781_p4 = scmp.lt.s32.totalorder %s37_s10, %s37_s10 }
   0xd   :  { %p2777_p3 = scmp.ne.s32.totalorder %s37_s10, %s2776_s20  ;;  %p2782_p5 = scmp.lt.s32.totalorder %s2776_s20, %s2776_s20 }
   0xf   :  { %p2783_p6 = por %p2782_p5, %p2781_p4 }
  0x11   :  { %p2784_p7 = pnand %p2783_p6, %p2777_p3 }
  0x13   :  { %2787 = shalt.err (!%p2784_p7)
}
  0x14   :  { %s2954_s21 = smov 128   ;;  %s2955_s22 = smov 8  }
  0x15   :  { %42 = dma.hbm_to_vmem [thread:$0]  %s3466_s1, 256, %s37_s10, [#allocation6], %s2954_s21, %s2954_s21, %s2955_s22  }
  0x16   :  { %s2788_s27 = scalar_lea.hbm %s3468_s3, 3072 }
  0x17   :  { %p2789_p8 = scmp.ne.s32.totalorder %s3468_s3, %s2788_s27  ;;  %p2792_p9 = scmp.lt.u32.totalorder %s2788_s27, %s3468_s3 }
  0x19   :  { %p2794_p10 = pnand %p2792_p9, %p2789_p8 }
  0x1b   :  { %2797 = shalt.err (!%p2794_p10)
}
  0x1c   :  { %s2798_s13 = scalar_lea.vmem %s3021_s12, 3072  ;;  %p2803_p12 = scmp.lt.s32.totalorder %s3021_s12, %s3021_s12 }
  0x1d   :  { %p2799_p11 = scmp.ne.s32.totalorder %s3021_s12, %s2798_s13  ;;  %p2804_p13 = scmp.lt.s32.totalorder %s2798_s13, %s2798_s13 }
  0x1f   :  { %p2805_p0 = por %p2804_p13, %p2803_p12 }
  0x21   :  { %p2806_p1 = pnand %p2805_p0, %p2799_p11 }
  0x23   :  { %2809 = shalt.err (!%p2806_p1)
}
  0x24   :  { %s2956_s1 = smov 192   ;;  %s2957_s10 = smov 12  }
  0x25   :  { %64 = dma.hbm_to_vmem [thread:$0]  %s3468_s3, 3072, %s3021_s12, [#allocation9], %s2956_s1, %s2956_s1, %s2957_s10  }
  0x26   :  { %s2958_s16 = smov [#allocation11]   ;;  %s2959_s18 = smov [#allocation2]  }
  0x27   :  { %s84_s17 = sshll.u32 %s2958_s16, 4  ;;  %s24_s19 = sshll.u32 %s2959_s18, 4  ;;  %s85_s17 = int_to_ptr.vmem [resolvable:$true] %s84_s17  ;;  %s3055_s19 = int_to_ptr.vmem [resolvable:$true] %s24_s19 }
  0x28   :  { %s2810_s24 = scalar_lea.hbm %s3471_s6, 2048 }
  0x29   :  { %p2811_p2 = scmp.ne.s32.totalorder %s3471_s6, %s2810_s24  ;;  %p2814_p3 = scmp.lt.u32.totalorder %s2810_s24, %s3471_s6 }
  0x2b   :  { %p2816_p4 = pnand %p2814_p3, %p2811_p2 }
  0x2d   :  { %2819 = shalt.err (!%p2816_p4)
}
  0x2e   :  { %s2820_s3 = scalar_lea.vmem %s85_s17, 2048  ;;  %p2825_p6 = scmp.lt.s32.totalorder %s85_s17, %s85_s17 }
  0x2f   :  { %p2821_p5 = scmp.ne.s32.totalorder %s85_s17, %s2820_s3  ;;  %p2826_p7 = scmp.lt.s32.totalorder %s2820_s3, %s2820_s3 }
  0x31   :  { %p2827_p8 = por %p2826_p7, %p2825_p6 }
  0x33   :  { %p2828_p9 = pnand %p2827_p8, %p2821_p5 }
  0x35   :  { %2831 = shalt.err (!%p2828_p9)
}
  0x36   :  { %90 = dma.hbm_to_vmem [thread:$0]  %s3471_s6, 2048, %s85_s17, [#allocation12], %s2954_s21, %s2954_s21, %s2955_s22  }
  0x37   :  { %s2832_s13 = scalar_lea.hbm %s3465_s0, 512 }
  0x38   :  { %p2833_p10 = scmp.ne.s32.totalorder %s3465_s0, %s2832_s13  ;;  %p2836_p11 = scmp.lt.u32.totalorder %s2832_s13, %s3465_s0 }
  0x3a   :  { %p2838_p12 = pnand %p2836_p11, %p2833_p10 }
  0x3c   :  { %2841 = shalt.err (!%p2838_p12)
}
  0x3d   :  { %s2842_s16 = scalar_lea.vmem %s3055_s19, 512  ;;  %p2847_p0 = scmp.lt.s32.totalorder %s3055_s19, %s3055_s19 }
  0x3e   :  { %p2843_p13 = scmp.ne.s32.totalorder %s3055_s19, %s2842_s16  ;;  %p2848_p1 = scmp.lt.s32.totalorder %s2842_s16, %s2842_s16 }
  0x40   :  { %p2849_p2 = por %p2848_p1, %p2847_p0 }
  0x42   :  { %p2850_p3 = pnand %p2849_p2, %p2843_p13 }
  0x44   :  { %2853 = shalt.err (!%p2850_p3)
}
  0x45   :  { %30 = dma.hbm_to_vmem [thread:$0]  %s3465_s0, 512, %s3055_s19, [#allocation3], %s2954_s21, %s2954_s21, %s2955_s22  }
  0x46   :  { %s2960_s18 = smov [#allocation7]   ;;  %s2961_s23 = smov [#allocation10]  }
  0x47   :  { %s49_s20 = sshll.u32 %s2960_s18, 4  ;;  %s72_s24 = sshll.u32 %s2961_s23, 4  ;;  %s50_s20 = int_to_ptr.vmem [resolvable:$true] %s49_s20  ;;  %s3092_s24 = int_to_ptr.vmem [resolvable:$true] %s72_s24 }
  0x48   :  { %s2854_s27 = scalar_lea.hbm %s3467_s2, 128 }
  0x49   :  { %p2855_p4 = scmp.ne.s32.totalorder %s3467_s2, %s2854_s27  ;;  %p2858_p5 = scmp.lt.u32.totalorder %s2854_s27, %s3467_s2 }
  0x4b   :  { %p2860_p6 = pnand %p2858_p5, %p2855_p4 }
  0x4d   :  { %2863 = shalt.err (!%p2860_p6)
}
  0x4e   :  { %s2864_s0 = scalar_lea.vmem %s50_s20, 128  ;;  %p2869_p8 = scmp.lt.s32.totalorder %s50_s20, %s50_s20 }
  0x4f   :  { %p2865_p7 = scmp.ne.s32.totalorder %s50_s20, %s2864_s0  ;;  %p2870_p9 = scmp.lt.s32.totalorder %s2864_s0, %s2864_s0 }
  0x51   :  { %p2871_p10 = por %p2870_p9, %p2869_p8 }
  0x53   :  { %p2872_p11 = pnand %p2871_p10, %p2865_p7 }
  0x55   :  { %2875 = shalt.err (!%p2872_p11)
}
  0x56   :  { %52 = dma.hbm_to_vmem [thread:$0]  %s3467_s2, 128, %s50_s20, [#allocation6]  }
  0x57   :  { %s2876_s1 = scalar_lea.hbm %s3470_s5, 1024 }
  0x58   :  { %p2877_p12 = scmp.ne.s32.totalorder %s3470_s5, %s2876_s1  ;;  %p2880_p13 = scmp.lt.u32.totalorder %s2876_s1, %s3470_s5 }
  0x5a   :  { %p2882_p0 = pnand %p2880_p13, %p2877_p12 }
  0x5c   :  { %2885 = shalt.err (!%p2882_p0)
}
  0x5d   :  { %s2886_s6 = scalar_lea.vmem %s3092_s24, 1024  ;;  %p2891_p2 = scmp.lt.s32.totalorder %s3092_s24, %s3092_s24 }
  0x5e   :  { %p2887_p1 = scmp.ne.s32.totalorder %s3092_s24, %s2886_s6  ;;  %p2892_p3 = scmp.lt.s32.totalorder %s2886_s6, %s2886_s6 }
  0x60   :  { %p2893_p4 = por %p2892_p3, %p2891_p2 }
  0x62   :  { %p2894_p5 = pnand %p2893_p4, %p2887_p1 }
  0x64   :  { %2897 = shalt.err (!%p2894_p5)
}
  0x65   :  { %s2962_s2 = smov 64   ;;  %s2963_s17 = smov 4  }
  0x66   :  { %78 = dma.hbm_to_vmem [thread:$0]  %s3470_s5, 1024, %s3092_s24, [#allocation9], %s2962_s2, %s2962_s2, %s2963_s17  }
  0x67   :  { %s2964_s23 = smov [#allocation13]   ;;  %s2898_s28 = scalar_lea.hbm %s3473_s8, 2048 }
  0x68   :  { %s98_s25 = sshll.u32 %s2964_s23, 4  ;;  %p2899_p6 = scmp.ne.s32.totalorder %s3473_s8, %s2898_s28  ;;  %s99_s25 = int_to_ptr.vmem [resolvable:$true] %s98_s25 }
  0x69   :  { %p2902_p7 = scmp.lt.u32.totalorder %s2898_s28, %s3473_s8 }
  0x6b   :  { %p2904_p8 = pnand %p2902_p7, %p2899_p6 }
  0x6d   :  { %2907 = shalt.err (!%p2904_p8)
}
  0x6e   :  { %s2908_s19 = scalar_lea.vmem %s99_s25, 2048  ;;  %p2913_p10 = scmp.lt.s32.totalorder %s99_s25, %s99_s25 }
  0x6f   :  { %p2909_p9 = scmp.ne.s32.totalorder %s99_s25, %s2908_s19  ;;  %p2914_p11 = scmp.lt.s32.totalorder %s2908_s19, %s2908_s19 }
  0x71   :  { %p2915_p12 = por %p2914_p11, %p2913_p10 }
  0x73   :  { %p2916_p13 = pnand %p2915_p12, %p2909_p9 }
  0x75   :  { %2919 = shalt.err (!%p2916_p13)
}
  0x76   :  { %104 = dma.hbm_to_vmem [thread:$0]  %s3473_s8, 2048, %s99_s25, [#allocation12], %s2962_s2, %s2962_s2, %s2963_s17  }
  0x77   :  { %2942 = dma.done.wait [#allocation3], 512  }
  0x78   :  { %2943 = vsyncadd [#allocation3], 4294966784 }
  0x79   :  { %2944 = dma.done.wait [#allocation6], 384  }
  0x7a   :  { %2945 = vsyncadd [#allocation6], 4294966912 }
  0x7b   :  { %2946 = dma.done.wait [#allocation9], 4096  }
  0x7c   :  { %2947 = vsyncadd [#allocation9], 4294963200 }
  0x7d   :  { %2948 = dma.done.wait [#allocation12], 4096  }
  0x7e   :  { %2949 = vsyncadd [#allocation12], 4294963200  ;;  %v127_v0 = vld [vmem:[#allocation2] sm:$0xff]  ;;  %v129_v1 = vld [vmem:[#allocation2 + $0x10] sm:$0xff]  ;;  %v2965_v39 = vmov 0   ;;  %v179_v50 = vlaneseq  ;;  %vm2967_vm0 = vmmov 0  }
  0x7f   :  { %v128_v2 = vld [vmem:[#allocation2 + $0x8] sm:$0xff]  ;;  %134 = vadd.xlane.f32.xlu0 %v127_v0  ;;  %138 = vadd.xlane.f32.xlu1 %v129_v1  ;;  %v130_v3 = vld [vmem:[#allocation2 + $0x18] sm:$0xff]  ;;  %v2588_v6 = vld [vmem:[#allocation8 + $0x1c] ss:$12 sps:$4 sm:$0xff]   ;;  %vm498_vm1 = vcmask 261120   ;;  %vm593_vm2 = vcmask 130048  }
  0x80   :  { %v2585_v4 = vld [vmem:[#allocation8 + $0x4] ss:$12 sps:$4 sm:$0xff]   ;;  %v2587_v5 = vld [vmem:[#allocation8] ss:$12 sps:$4 sm:$0xff]   ;;  %v2590_v7 = vld [vmem:[#allocation8 + $0x8] ss:$12 sps:$4 sm:$0xff]   ;;  %406 = vmatprep.mubr.bf16.mxu0 %v2965_v39 }
  0x81   :  { %374 = vmatprep.subr.bf16.mxu0 %v2585_v4  ;;  %2406 = vmatprep.subr.bf16.mxu1 %v2590_v7  ;;  %v2591_v24 = vld [vmem:[#allocation8 + $0x18] ss:$12 sps:$4 sm:$0xff]   ;;  %v2592_v25 = vld [vmem:[#allocation8 + $0x34] ss:$12 sps:$4 sm:$0xff]   ;;  %v2595_v27 = vld [vmem:[#allocation8 + $0x30] ss:$12 sps:$4 sm:$0xff]  }
  0x82   :  { %375 = vmatpush1.bf16.msra.mxu0 %v2587_v5  ;;  %2407 = vmatpush3.bf16.msra.mxu1 %v2590_v7  ;;  %v2594_v26 = vld [vmem:[#allocation8 + $0x20] ss:$12 sps:$4 sm:$0xff]   ;;  %v2598_v29 = vld [vmem:[#allocation8 + $0x38] ss:$12 sps:$4 sm:$0xff]   ;;  %v2599_v30 = vld [vmem:[#allocation8 + $0x48] ss:$12 sps:$4 sm:$0xff]  }
  0x83   :  { %136 = vadd.xlane.f32.xlu0 %v128_v2  ;;  %140 = vadd.xlane.f32.xlu1 %v130_v3  ;;  %v2596_v28 = vld [vmem:[#allocation8 + $0x4c] ss:$12 sps:$4 sm:$0xff]   ;;  %v2600_v31 = vld [vmem:[#allocation8 + $0x64] ss:$12 sps:$4 sm:$0xff]   ;;  %v2604_v34 = vld [vmem:[#allocation8 + $0x7c] ss:$12 sps:$4 sm:$0xff]  }
  0x84   :  { %376 = vmatprep.subr.bf16.mxu0 %v2588_v6  ;;  %2408 = vmatprep.subr.bf16.mxu1 %v2594_v26  ;;  %v2602_v32 = vld [vmem:[#allocation8 + $0x50] ss:$12 sps:$4 sm:$0xff]   ;;  %v2603_v33 = vld [vmem:[#allocation8 + $0x60] ss:$12 sps:$4 sm:$0xff]   ;;  %v2606_v35 = vld [vmem:[#allocation8 + $0x68] ss:$12 sps:$4 sm:$0xff]  }
  0x85   :  { %v2607_v36 = vld [vmem:[#allocation8 + $0x78] ss:$12 sps:$4 sm:$0xff]   ;;  %v2608_v37 = vld [vmem:[#allocation8 + $0x94] ss:$12 sps:$4 sm:$0xff]   ;;  %v2611_v40 = vld [vmem:[#allocation8 + $0x90] ss:$12 sps:$4 sm:$0xff]  }
  0x86   :  { %377 = vmatpush1.bf16.msra.mxu0 %v2591_v24  ;;  %2409 = vmatpush3.bf16.msra.mxu1 %v2594_v26  ;;  %v2610_v38 = vld [vmem:[#allocation8 + $0x80] ss:$12 sps:$4 sm:$0xff]   ;;  %v2614_v42 = vld [vmem:[#allocation8 + $0x98] ss:$12 sps:$4 sm:$0xff]   ;;  %v2615_v43 = vld [vmem:[#allocation8 + $0xa8] ss:$12 sps:$4 sm:$0xff]  }
  0x87   :  { %378 = vmatprep.subr.bf16.mxu0 %v2592_v25  ;;  %2410 = vmatprep.subr.bf16.mxu1 %v2598_v29  ;;  %v2612_v41 = vld [vmem:[#allocation8 + $0xac] ss:$12 sps:$4 sm:$0xff]   ;;  %v2616_v44 = vld [vmem:[#allocation8 + $0xb0] ss:$12 sps:$4 sm:$0xff]   ;;  %v3156_v56 = vshrl.u32 %v179_v50, 7  ;;  %s2969_s11 = smov 32  }
  0x88   :  { %v133_v60 = vld [vmem:[#allocation7] sm:$0x3f] }
  0x89   :  { %v3159_v59 = vsub.s32 0, %v3156_v56 }
  0x8a   :  { %379 = vmatpush1.bf16.msra.mxu0 %v2595_v27  ;;  %2411 = vmatpush3.bf16.msra.mxu1 %v2598_v29 }
  0x8b   :  { %380 = vmatprep.subr.bf16.mxu0 %v2596_v28  ;;  %2412 = vmatprep.subr.bf16.mxu1 %v2602_v32  ;;  %v182_v63 = vrot.slane %v133_v60, %v3159_v59 }
  0x8e   :  { %381 = vmatpush1.bf16.msra.mxu0 %v2599_v30  ;;  %2413 = vmatpush3.bf16.msra.mxu1 %v2602_v32 }
  0x8f   :  { %382 = vmatprep.subr.bf16.mxu0 %v2600_v31  ;;  %2414 = vmatprep.subr.bf16.mxu1 %v2606_v35 }
  0x92   :  { %383 = vmatpush1.bf16.msra.mxu0 %v2603_v33  ;;  %2415 = vmatpush3.bf16.msra.mxu1 %v2606_v35 }
  0x93   :  { %384 = vmatprep.subr.bf16.mxu0 %v2604_v34  ;;  %2416 = vmatprep.subr.bf16.mxu1 %v2610_v38 }
  0x96   :  { %385 = vmatpush1.bf16.msra.mxu0 %v2607_v36  ;;  %2417 = vmatpush3.bf16.msra.mxu1 %v2610_v38 }
  0x97   :  { %386 = vmatprep.subr.bf16.mxu0 %v2608_v37  ;;  %2418 = vmatprep.subr.bf16.mxu1 %v2614_v42 }
  0x9a   :  { %387 = vmatpush1.bf16.msra.mxu0 %v2611_v40  ;;  %2419 = vmatpush3.bf16.msra.mxu1 %v2614_v42 }
  0x9b   :  { %388 = vmatprep.subr.bf16.mxu0 %v2612_v41  ;;  %2420 = vmatprep.subr.bf16.mxu1 %v2616_v44 }
  0x9e   :  { %389 = vmatpush1.bf16.msra.mxu0 %v2615_v43  ;;  %2421 = vmatpush3.bf16.msra.mxu1 %v2616_v44 }
 0x10c   :  { %v135_v8 = vpop.xlane.xlu0 %134  ;;  %v139_v9 = vpop.xlane.xlu1 %138 }
 0x10d   :  { %v143_v10 = vmul.f32 0.0078125, %v135_v8  ;;  %v145_v11 = vmul.f32 0.0078125, %v139_v9 }
 0x10f   :  { %v3139_v12 = vsub.f32 %v127_v0, %v143_v10  ;;  %v3141_v13 = vsub.f32 %v129_v1, %v145_v11  ;;  %v3164_v0 = vsub.s32 1, %v3156_v56 }
 0x110   :  { %v137_v14 = vpop.xlane.xlu0 %136  ;;  %v141_v15 = vpop.xlane.xlu1 %140 }
 0x111   :  { %v144_v16 = vmul.f32 0.0078125, %v137_v14  ;;  %v151_v17 = vmul.f32 %v3139_v12, %v3139_v12  ;;  %v146_v18 = vmul.f32 0.0078125, %v141_v15  ;;  %v153_v21 = vmul.f32 %v3141_v13, %v3141_v13 }
 0x112   :  { %v190_v5 = vrot.slane %v133_v60, %v3164_v0 }
 0x113   :  { %v3145_v19 = vsub.f32 %v128_v2, %v144_v16  ;;  %155 = vadd.xlane.f32.xlu0 %v151_v17  ;;  %v3147_v20 = vsub.f32 %v130_v3, %v146_v18 }
 0x115   :  { %v152_v22 = vmul.f32 %v3145_v19, %v3145_v19  ;;  %v154_v23 = vmul.f32 %v3147_v20, %v3147_v20 }
 0x117   :  { %159 = vadd.xlane.f32.xlu0 %v153_v21  ;;  %157 = vadd.xlane.f32.xlu1 %v152_v22  ;;  %v241_v21 = vsub.s32 2, %v3156_v56 }
 0x11b   :  { %161 = vadd.xlane.f32.xlu1 %v154_v23 }
 0x1a0   :  { %v156_v45 = vpop.xlane.xlu0 %155 }
 0x1a1   :  { %v163_v46 = vmul.f32 0.0078125, %v156_v45 }
 0x1a3   :  { %v167_v47 = vadd.f32 1e-05, %v163_v46 }
 0x1a4   :  { %v158_v48 = vpop.xlane.xlu1 %157  ;;  %v160_v49 = vpop.xlane.xlu0 %159 }
 0x1a5   :  { %2665 = vrsqrt.f32 %v167_v47  ;;  %v164_v51 = vmul.f32 0.0078125, %v158_v48  ;;  %v165_v52 = vmul.f32 0.0078125, %v160_v49 }
 0x1a7   :  { %v168_v53 = vadd.f32 1e-05, %v164_v51  ;;  %v169_v54 = vadd.f32 1e-05, %v165_v52 }
 0x1a8   :  { %v162_v55 = vpop.xlane.xlu1 %161 }
 0x1a9   :  { %2667 = vrsqrt.f32 %v168_v53  ;;  %v166_v57 = vmul.f32 0.0078125, %v162_v55 }
 0x1aa   :  { %2669 = vrsqrt.f32 %v169_v54 }
 0x1ab   :  { %v170_v58 = vadd.f32 1e-05, %v166_v57 }
 0x1ad   :  { %2671 = vrsqrt.f32 %v170_v58 }
 0x1af   :  { %v2666_v61 = vpop.eup %2665 }
 0x1b0   :  { %v175_v62 = vmul.f32 %v2666_v61, %v3139_v12 }
 0x1b2   :  { %v183_v4 = vmul.f32 %v182_v63, %v175_v62 }
 0x1b3   :  { %v2668_v1 = vpop.eup %2667 }
 0x1b4   :  { %v2670_v2 = vpop.eup %2669  ;;  %v176_v3 = vmul.f32 %v2668_v1, %v3145_v19  ;;  %v191_v9 = vadd.f32 %v190_v5, %v183_v4  ;;  %v2966_v19 = vmov 0.0   ;;  %v3218_v4 = vld [vmem:[#allocation5 + $0x8] sm:$0xff] }
 0x1b5   :  { %v177_v6 = vmul.f32 %v2670_v2, %v3141_v13  ;;  %2426 = vmatprep.subr.bf16.mxu1 %v2966_v19  ;;  %2432 = vmatprep.subr.bf16.mxu0 %v2966_v19  ;;  %v229_v13 = vld [vmem:[%s3469_s4] sm:$0x7]  ;;  %s2968_s4 = smov 96  }
 0x1b6   :  { %v184_v7 = vmul.f32 %v182_v63, %v176_v3  ;;  %v238_v23 = vrot.slane %v229_v13, %v3164_v0  ;;  %v242_v29 = vrot.slane %v229_v13, %v241_v21 }
 0x1b7   :  { %v2672_v8 = vpop.eup %2671  ;;  %v185_v12 = vmul.f32 %v182_v63, %v177_v6 }
 0x1b8   :  { %v192_v10 = vadd.f32 %v190_v5, %v184_v7  ;;  %v178_v11 = vmul.f32 %v2672_v8, %v3147_v20  ;;  %v234_v20 = vrot.slane %v229_v13, %v3159_v59 }
 0x1b9   :  { %v193_v16 = vadd.f32 %v190_v5, %v185_v12 }
 0x1ba   :  { %v195_v14 = vpack.c.bf16 %v192_v10, %v191_v9  ;;  %v186_v15 = vmul.f32 %v182_v63, %v178_v11  ;;  %v3215_v63 = vld [vmem:[#allocation5] sm:$0xff] }
 0x1bc   :  { %407 = vmatmul.mubr.bf16.vlgmr.msra.gmra.mrb[0].mxu0 %v195_v14  ;;  %2422 = vmatprep.mubr.bf16.mxu1 %v195_v14  ;;  %v194_v17 = vadd.f32 %v190_v5, %v186_v15 }
 0x1bd   :  { %416 = vmatprep.mubr.bf16.mxu0 %v2965_v39 }
 0x1be   :  { %v196_v18 = vpack.c.bf16 %v194_v17, %v193_v16 }
 0x1c0   :  { %2423 = vmatmul.mubr.bf16.vlgmr.msra.gmra.mrb[0].mxu1 %v196_v18 }
 0x1c1   :  { %2428 = vmatprep.mubr.msk.bf16.mxu1 %vm2967_vm0, %v2966_v19 }
 0x1c4   :  { %417 = vmatmul.mubr.bf16.gmra.mrb[4].mxu0 %v196_v18 }
 0x1c5   :  { %2434 = vmatprep.mubr.msk.bf16.mxu0 %vm2967_vm0, %v2966_v19 }
 0x28f   :  { %v408_v22 = vpop.f32.mrb[0].mxu0 }
 0x290   :  { %v410_v24 = vpop.f32.mrb[1].mxu0  ;;  %v409_v26 = vadd.f32 %v408_v22, %v234_v20 }
 0x291   :  { %v412_v25 = vpop.f32.mrb[2].mxu0  ;;  %v411_v30 = vadd.f32 %v410_v24, %v238_v23 }
 0x292   :  { %v413_v27 = vadd.f32 %v412_v25, %v234_v20  ;;  %v414_v28 = vpop.f32.mrb[3].mxu0 }
 0x293   :  { %v415_v31 = vadd.f32 %v414_v28, %v238_v23  ;;  %v2424_v32 = vpop.f32.mrb[0].mxu1 }
 0x294   :  { %v3185_v33 = vpack.c.bf16 %v413_v27, %v409_v26  ;;  %v461_v34 = vpop.f32.mrb[1].mxu1  ;;  %v470_v37 = vadd.f32 %v2424_v32, %v242_v29 }
 0x295   :  { %v3187_v35 = vpack.c.bf16 %v415_v31, %v411_v30  ;;  %v2425_v36 = vpop.f32.mrb[2].mxu1  ;;  %v462_v41 = vadd.f32 %v461_v34, %v242_v29 }
 0x296   :  { %v473_v38 = vadd.f32 %v2425_v36, %v242_v29  ;;  %v464_v40 = vpop.f32.mrb[3].mxu1 }
 0x297   :  { %v465_v42 = vadd.f32 %v464_v40, %v242_v29  ;;  %v418_v43 = vpop.f32.mrb[4].mxu0  ;;  %v503_v44 = vsel %vm498_vm1, %v3187_v35, 0 }
 0x298   :  { %v3191_v45 = vpack.c.bf16 %v473_v38, %v470_v37  ;;  %v420_v46 = vpop.f32.mrb[5].mxu0  ;;  %2427 = vmatpush3.bf16.xpose.msra.mxu1 %v503_v44  ;;  %v419_v49 = vadd.f32 %v418_v43, %v234_v20 }
 0x299   :  { %v3193_v47 = vpack.c.bf16 %v465_v42, %v462_v41  ;;  %v422_v48 = vpop.f32.mrb[6].mxu0  ;;  %2438 = vmatprep.subr.bf16.mxu1 %v2966_v19  ;;  %v421_v52 = vadd.f32 %v420_v46, %v238_v23 }
 0x29a   :  { %v423_v50 = vadd.f32 %v422_v48, %v234_v20  ;;  %v424_v51 = vpop.f32.mrb[7].mxu0 }
 0x29b   :  { %v425_v53 = vadd.f32 %v424_v51, %v238_v23 }
 0x29c   :  { %v3196_v54 = vpack.c.bf16 %v423_v50, %v419_v49 }
 0x29d   :  { %v3198_v55 = vpack.c.bf16 %v425_v53, %v421_v52 }
 0x29f   :  { %2429 = vmatmul.mubr.msk.bf16.vlgmr.msra.gmra.mrb[4].mxu1 %vm498_vm1, %v3185_v33  ;;  %v550_v57 = vsel %vm498_vm1, %v3198_v55, 0 }
 0x2a0   :  { %2433 = vmatpush3.bf16.xpose.msra.mxu0 %v550_v57  ;;  %2439 = vmatpush3.bf16.msra.mxu1 %v3193_v47 }
 0x2a1   :  { %2444 = vmatprep.subr.bf16.mxu0 %v2966_v19  ;;  %2440 = vmatprep.mubr.msk.bf16.mxu1 %vm2967_vm0, %v2966_v19 }
 0x2a2   :  { %2450 = vmatprep.subr.bf16.mxu1 %v2966_v19 }
 0x2a7   :  { %2435 = vmatmul.mubr.msk.bf16.vlgmr.msra.gmra.mrb[8].mxu0 %vm498_vm1, %v3196_v54 }
 0x2a8   :  { %2445 = vmatpush3.bf16.msra.mxu0 %v3191_v45  ;;  %2446 = vmatprep.mubr.msk.bf16.mxu0 %vm2967_vm0, %v2966_v19 }
 0x2a9   :  { %2456 = vmatprep.subr.bf16.mxu0 %v2966_v19 }
 0x372   :  { %v539_v58 = vpop.f32.mrb[4].mxu1 }
 0x373   :  { %v2430_v60 = vpop.f32.mrb[5].mxu1  ;;  %v540_v23 = vadd.f32 %v539_v58, %v3215_v63 }
 0x374   :  { %v542_v61 = vpop.f32.mrb[6].mxu1 }
 0x375   :  { %v2431_v62 = vpop.f32.mrb[7].mxu1  ;;  %v543_v22 = vadd.f32 %v542_v61, %v3218_v4  ;;  %v594_v25 = vsel %vm593_vm2, %v540_v23, -inf }
 0x377   :  { %v597_v24 = vsel %vm593_vm2, %v543_v22, -inf }
 0x37a   :  { %v586_v1 = vpop.f32.mrb[8].mxu0 }
 0x37b   :  { %v587_v2 = vadd.f32 %v586_v1, %v3215_v63  ;;  %v2436_v3 = vpop.f32.mrb[9].mxu0 }
 0x37c   :  { %v589_v5 = vpop.f32.mrb[10].mxu0 }
 0x37d   :  { %v590_v6 = vadd.f32 %v589_v5, %v3218_v4  ;;  %v2437_v7 = vpop.f32.mrb[11].mxu0  ;;  %v600_v8 = vsel %vm593_vm2, %v587_v2, -inf }
 0x37e   :  { %601 = vmax.xlane.f32.xlu0 %v600_v8 }
 0x37f   :  { %v603_v9 = vsel %vm593_vm2, %v590_v6, -inf }
 0x380   :  { %604 = vmax.xlane.f32.xlu1 %v603_v9 }
 0x40b   :  { %v602_v10 = vpop.xlane.xlu0 %601 }
 0x40c   :  { %v608_v11 = vsub.f32 %v587_v2, %v602_v10 }
 0x40d   :  { %v605_v12 = vpop.xlane.xlu1 %604 }
 0x40e   :  { %v614_v14 = vmul.f32 1.442695, %v608_v11  ;;  %v609_v15 = vsub.f32 %v590_v6, %v605_v12 }
 0x410   :  { %2673 = vpow2.f32 %v614_v14  ;;  %v616_v16 = vmul.f32 1.442695, %v609_v15 }
 0x412   :  { %2675 = vpow2.f32 %v616_v16 }
 0x41a   :  { %v2674_v17 = vpop.eup %2673 }
 0x41b   :  { %v624_v18 = vsel %vm593_vm2, %v2674_v17, 0.0 }
 0x41c   :  { %v2676_v13 = vpop.eup %2675  ;;  %625 = vadd.xlane.f32.xlu0 %v624_v18 }
 0x41d   :  { %v627_v20 = vsel %vm593_vm2, %v2676_v13, 0.0 }
 0x41e   :  { %628 = vadd.xlane.f32.xlu1 %v627_v20 }
 0x42f   :  { %784 = vrot.lane.b32.xlu1 %v3196_v54, %s2968_s4 }
 0x432   :  { %787 = vrot.lane.b32.xlu0 %v3198_v55, %s2968_s4 }
 0x451   :  { %598 = vmax.xlane.f32.xlu0 %v597_v24 }
 0x453   :  { %595 = vmax.xlane.f32.xlu1 %v594_v25 }
 0x4a9   :  { %v626_v26 = vpop.xlane.xlu0 %625 }
 0x4aa   :  { %2677 = vrcp.f32 %v626_v26 }
 0x4ab   :  { %v629_v27 = vpop.xlane.xlu1 %628 }
 0x4ac   :  { %2679 = vrcp.f32 %v629_v27 }
 0x4ad   :  { %v788_v32 = vpop.permute.xlu0 %787 }
 0x4ae   :  { %v793_v36 = vsel %vm498_vm1, %v788_v32, 0 }
 0x4af   :  { %v785_v37 = vpop.permute.xlu1 %784 }
 0x4b4   :  { %v2678_v28 = vpop.eup %2677 }
 0x4b5   :  { %v635_v30 = vmul.f32 %v2678_v28, %v2674_v17 }
 0x4b6   :  { %v2680_v29 = vpop.eup %2679 }
 0x4b7   :  { %v637_v31 = vmul.f32 %v2680_v29, %v2676_v13 }
 0x4b9   :  { %v639_v34 = vpack.c.bf16 %v637_v31, %v635_v30 }
 0x4bb   :  { %2447 = vmatmul.mubr.msk.bf16.vlgmr.msra.gmra.mrb[12].mxu0 %vm593_vm2, %v639_v34 }
 0x4bc   :  { %2457 = vmatpush3.bf16.xpose.msra.mxu0 %v793_v36  ;;  %2458 = vmatprep.mubr.msk.bf16.mxu0 %vm2967_vm0, %v2966_v19 }
 0x4bd   :  { %2468 = vmatprep.subr.bf16.mxu0 %v2966_v19 }
 0x4c3   :  { %2459 = vmatmul.mubr.msk.bf16.vlgmr.msra.gmra.mrb[16].mxu0 %vm498_vm1, %v785_v37 }
 0x4c4   :  { %2470 = vmatprep.mubr.msk.bf16.mxu0 %vm2967_vm0, %v2966_v19 }
 0x4de   :  { %v599_v38 = vpop.xlane.xlu0 %598 }
 0x4df   :  { %v607_v40 = vsub.f32 %v543_v22, %v599_v38 }
 0x4e0   :  { %v596_v41 = vpop.xlane.xlu1 %595 }
 0x4e1   :  { %v612_v42 = vmul.f32 1.442695, %v607_v40  ;;  %v606_v43 = vsub.f32 %v540_v23, %v596_v41 }
 0x4e3   :  { %2681 = vpow2.f32 %v612_v42  ;;  %v610_v44 = vmul.f32 1.442695, %v606_v43 }
 0x4e5   :  { %2683 = vpow2.f32 %v610_v44 }
 0x4ed   :  { %v2682_v46 = vpop.eup %2681 }
 0x4ee   :  { %v621_v48 = vsel %vm593_vm2, %v2682_v46, 0.0 }
 0x4ef   :  { %v2684_v49 = vpop.eup %2683  ;;  %622 = vadd.xlane.f32.xlu1 %v621_v48 }
 0x4f0   :  { %v618_v50 = vsel %vm593_vm2, %v2684_v49, 0.0 }
 0x4f1   :  { %619 = vadd.xlane.f32.xlu0 %v618_v50 }
 0x500   :  { %731 = vrot.lane.b32.xlu1 %v3185_v33, %s2968_s4 }
 0x507   :  { %734 = vrot.lane.b32.xlu0 %v3187_v35, %s2968_s4 }
 0x57c   :  { %v623_v51 = vpop.xlane.xlu1 %622 }
 0x57d   :  { %2685 = vrcp.f32 %v623_v51 }
 0x57e   :  { %v620_v52 = vpop.xlane.xlu0 %619 }
 0x57f   :  { %2687 = vrcp.f32 %v620_v52 }
 0x580   :  { %v732_v8 = vpop.permute.xlu1 %731 }
 0x582   :  { %v735_v61 = vpop.permute.xlu0 %734 }
 0x583   :  { %v740_v1 = vsel %vm498_vm1, %v735_v61, 0 }
 0x587   :  { %v2686_v53 = vpop.eup %2685 }
 0x588   :  { %v633_v58 = vmul.f32 %v2686_v53, %v2682_v46 }
 0x589   :  { %v2688_v57 = vpop.eup %2687 }
 0x58a   :  { %v631_v60 = vmul.f32 %v2688_v57, %v2684_v49 }
 0x58c   :  { %v638_v62 = vpack.c.bf16 %v633_v58, %v631_v60 }
 0x58e   :  { %2441 = vmatmul.mubr.msk.bf16.vlgmr.msra.gmra.mrb[8].mxu1 %vm593_vm2, %v638_v62  ;;  %v3249_v2 = vpop.f32.mrb[12].mxu0 }
 0x58f   :  { %2451 = vmatpush3.bf16.xpose.msra.mxu1 %v740_v1  ;;  %v2448_v3 = vpop.f32.mrb[13].mxu0  ;;  %2452 = vmatprep.mubr.msk.bf16.mxu1 %vm2967_vm0, %v2966_v19 }
 0x590   :  { %v3253_v5 = vpop.f32.mrb[14].mxu0  ;;  %2462 = vmatprep.subr.bf16.mxu1 %v2966_v19 }
 0x591   :  { %v729_v6 = vpack.c.bf16 %v3253_v5, %v3249_v2  ;;  %v2449_v7 = vpop.f32.mrb[15].mxu0 }
 0x596   :  { %2453 = vmatmul.mubr.msk.bf16.vlgmr.msra.gmra.mrb[12].mxu1 %vm498_vm1, %v732_v8  ;;  %v829_v9 = vpop.f32.mrb[16].mxu0 }
 0x597   :  { %v830_v10 = vadd.f32 %v829_v9, %v3215_v63  ;;  %v2460_v11 = vpop.f32.mrb[17].mxu0  ;;  %2464 = vmatprep.mubr.msk.bf16.mxu1 %vm2967_vm0, %v2966_v19 }
 0x598   :  { %v832_v12 = vpop.f32.mrb[18].mxu0 }
 0x599   :  { %v833_v14 = vadd.f32 %v832_v12, %v3218_v4  ;;  %v2461_v15 = vpop.f32.mrb[19].mxu0  ;;  %v842_v16 = vsel %vm593_vm2, %v830_v10, -inf }
 0x59a   :  { %843 = vmax.xlane.f32.xlu1 %v842_v16 }
 0x59b   :  { %v845_v17 = vsel %vm593_vm2, %v833_v14, -inf }
 0x59c   :  { %846 = vmax.xlane.f32.xlu0 %v845_v17 }
 0x5ab   :  { %1116 = vrot.lane.b32.xlu1 %v3187_v35, %s2962_s2 }
 0x627   :  { %v844_v18 = vpop.xlane.xlu1 %843 }
 0x628   :  { %v850_v13 = vsub.f32 %v830_v10, %v844_v18 }
 0x629   :  { %v847_v20 = vpop.xlane.xlu0 %846 }
 0x62a   :  { %v856_v22 = vmul.f32 1.442695, %v850_v13  ;;  %v851_v23 = vsub.f32 %v833_v14, %v847_v20 }
 0x62b   :  { %v1117_v46 = vpop.permute.xlu1 %1116 }
 0x62c   :  { %2689 = vpow2.f32 %v856_v22  ;;  %v858_v24 = vmul.f32 1.442695, %v851_v23  ;;  %v1122_v61 = vsel %vm498_vm1, %v1117_v46, 0 }
 0x62e   :  { %2691 = vpow2.f32 %v858_v24 }
 0x636   :  { %v2690_v25 = vpop.eup %2689 }
 0x637   :  { %v866_v26 = vsel %vm593_vm2, %v2690_v25, 0.0 }
 0x638   :  { %v2692_v27 = vpop.eup %2691  ;;  %867 = vadd.xlane.f32.xlu0 %v866_v26 }
 0x639   :  { %v869_v28 = vsel %vm593_vm2, %v2692_v27, 0.0 }
 0x63a   :  { %870 = vadd.xlane.f32.xlu1 %v869_v28 }
 0x64b   :  { %1114 = vrot.lane.b32.xlu1 %v3185_v33, %s2962_s2 }
 0x64e   :  { %931 = vrot.lane.b32.xlu0 %v3191_v45, %s2968_s4 }
 0x64f   :  { %1167 = vrot.lane.b32.xlu1 %v3198_v55, %s2962_s2 }
 0x652   :  { %1165 = vrot.lane.b32.xlu0 %v3196_v54, %s2962_s2 }
 0x661   :  { %v3277_v29 = vpop.f32.mrb[8].mxu1 }
 0x662   :  { %v2442_v30 = vpop.f32.mrb[9].mxu1 }
 0x663   :  { %v3279_v31 = vpop.f32.mrb[10].mxu1 }
 0x664   :  { %v728_v32 = vpack.c.bf16 %v3279_v31, %v3277_v29  ;;  %v2443_v34 = vpop.f32.mrb[11].mxu1 }
 0x669   :  { %v776_v36 = vpop.f32.mrb[12].mxu1 }
 0x66a   :  { %v2454_v37 = vpop.f32.mrb[13].mxu1  ;;  %v777_v42 = vadd.f32 %v776_v36, %v3215_v63 }
 0x66b   :  { %v779_v38 = vpop.f32.mrb[14].mxu1 }
 0x66c   :  { %v780_v40 = vadd.f32 %v779_v38, %v3218_v4  ;;  %v2455_v41 = vpop.f32.mrb[15].mxu1  ;;  %v836_v44 = vsel %vm593_vm2, %v777_v42, -inf }
 0x66e   :  { %v839_v43 = vsel %vm593_vm2, %v780_v40, -inf }
 0x671   :  { %840 = vmax.xlane.f32.xlu0 %v839_v43 }
 0x673   :  { %837 = vmax.xlane.f32.xlu1 %v836_v44 }
 0x684   :  { %883 = vrot.lane.b32.xlu1 %v3193_v47, %s2968_s4 }
 0x6c5   :  { %v868_v48 = vpop.xlane.xlu0 %867 }
 0x6c6   :  { %2693 = vrcp.f32 %v868_v48 }
 0x6c7   :  { %v871_v49 = vpop.xlane.xlu1 %870 }
 0x6c8   :  { %2695 = vrcp.f32 %v871_v49 }
 0x6c9   :  { %v932_v50 = vpop.permute.xlu0 %931 }
 0x6ca   :  { %2469 = vmatpush3.bf16.msra.mxu0 %v932_v50 }
 0x6cb   :  { %2490 = vmatprep.subr.bf16.mxu0 %v2966_v19  ;;  %v1115_v60 = vpop.permute.xlu1 %1114 }
 0x6cd   :  { %v1166_v3 = vpop.permute.xlu0 %1165 }
 0x6cf   :  { %v1168_v62 = vpop.permute.xlu1 %1167 }
 0x6d0   :  { %v2694_v51 = vpop.eup %2693  ;;  %v1173_v1 = vsel %vm498_vm1, %v1168_v62, 0  ;;  %v2619_v62 = vld [vmem:[#allocation10] sm:$0xff]  }
 0x6d1   :  { %v877_v53 = vmul.f32 %v2694_v51, %v2690_v25 }
 0x6d2   :  { %v2696_v52 = vpop.eup %2695 }
 0x6d3   :  { %v879_v57 = vmul.f32 %v2696_v52, %v2692_v27 }
 0x6d5   :  { %v881_v58 = vpack.c.bf16 %v879_v57, %v877_v53 }
 0x6d7   :  { %2471 = vmatmul.mubr.msk.bf16.vlgmr.msra.gmra.mrb[20].mxu0 %vm593_vm2, %v881_v58 }
 0x6d8   :  { %2491 = vmatpush3.bf16.xpose.msra.mxu0 %v1122_v61  ;;  %2492 = vmatprep.mubr.msk.bf16.mxu0 %vm2967_vm0, %v2966_v19  ;;  %v2618_v61 = vld [vmem:[#allocation10 + $0x18] sm:$0xff]  }
 0x6d9   :  { %2496 = vmatprep.subr.bf16.mxu0 %v2966_v19 }
 0x6df   :  { %2493 = vmatmul.mubr.msk.bf16.vlgmr.msra.gmra.mrb[24].mxu0 %vm498_vm1, %v1115_v60  ;;  %v2617_v60 = vld [vmem:[#allocation10 + $0x10] sm:$0xff]  }
 0x6e0   :  { %2497 = vmatpush3.bf16.xpose.msra.mxu0 %v1173_v1  ;;  %2498 = vmatprep.mubr.msk.bf16.mxu0 %vm2967_vm0, %v2966_v19 }
 0x6e1   :  { %2508 = vmatprep.subr.bf16.mxu0 %v2966_v19 }
 0x6e7   :  { %2499 = vmatmul.mubr.msk.bf16.vlgmr.msra.gmra.mrb[28].mxu0 %vm498_vm1, %v1166_v3 }
 0x6e8   :  { %2510 = vmatprep.mubr.msk.bf16.mxu0 %vm2967_vm0, %v2966_v19 }
 0x6fe   :  { %v841_v7 = vpop.xlane.xlu0 %840 }
 0x6ff   :  { %v849_v8 = vsub.f32 %v780_v40, %v841_v7 }
 0x700   :  { %v838_v9 = vpop.xlane.xlu1 %837 }
 0x701   :  { %v848_v10 = vsub.f32 %v777_v42, %v838_v9  ;;  %v854_v11 = vmul.f32 1.442695, %v849_v8 }
 0x703   :  { %v852_v12 = vmul.f32 1.442695, %v848_v10 }
 0x704   :  { %v884_v14 = vpop.permute.xlu1 %883 }
 0x705   :  { %2697 = vpow2.f32 %v852_v12  ;;  %2463 = vmatpush3.bf16.msra.mxu1 %v884_v14 }
 0x706   :  { %2699 = vpow2.f32 %v854_v11  ;;  %2474 = vmatprep.subr.bf16.mxu1 %v2617_v60 }
 0x70f   :  { %v2698_v15 = vpop.eup %2697 }
 0x710   :  { %v860_v16 = vsel %vm593_vm2, %v2698_v15, 0.0  ;;  %v2700_v17 = vpop.eup %2699 }
 0x711   :  { %861 = vadd.xlane.f32.xlu0 %v860_v16  ;;  %v863_v18 = vsel %vm593_vm2, %v2700_v17, 0.0 }
 0x715   :  { %864 = vadd.xlane.f32.xlu0 %v863_v18 }
 0x79e   :  { %v862_v13 = vpop.xlane.xlu0 %861 }
 0x79f   :  { %2701 = vrcp.f32 %v862_v13 }
 0x7a2   :  { %v865_v20 = vpop.xlane.xlu0 %864 }
 0x7a3   :  { %2703 = vrcp.f32 %v865_v20 }
 0x7a9   :  { %v2702_v23 = vpop.eup %2701 }
 0x7aa   :  { %v3305_v22 = vpop.f32.mrb[20].mxu0  ;;  %v873_v30 = vmul.f32 %v2702_v23, %v2698_v15 }
 0x7ab   :  { %v2472_v24 = vpop.f32.mrb[21].mxu0 }
 0x7ac   :  { %v3307_v25 = vpop.f32.mrb[22].mxu0 }
 0x7ad   :  { %v2704_v26 = vpop.eup %2703  ;;  %v979_v27 = vpack.c.bf16 %v3307_v25, %v3305_v22  ;;  %v2473_v28 = vpop.f32.mrb[23].mxu0 }
 0x7ae   :  { %v875_v34 = vmul.f32 %v2704_v26, %v2700_v17 }
 0x7b0   :  { %v880_v36 = vpack.c.bf16 %v875_v34, %v873_v30 }
 0x7b2   :  { %2465 = vmatmul.mubr.msk.bf16.vlgmr.msra.gmra.mrb[16].mxu1 %vm593_vm2, %v880_v36  ;;  %v1158_v37 = vpop.f32.mrb[24].mxu0 }
 0x7b3   :  { %v1159_v38 = vadd.f32 %v1158_v37, %v3215_v63  ;;  %v2494_v40 = vpop.f32.mrb[25].mxu0  ;;  %2475 = vmatpush3.bf16.msra.mxu1 %v2617_v60 }
 0x7b4   :  { %v1161_v41 = vpop.f32.mrb[26].mxu0  ;;  %2476 = vmatprep.subr.bf16.mxu1 %v2618_v61 }
 0x7b5   :  { %v1162_v42 = vadd.f32 %v1161_v41, %v3218_v4  ;;  %v2495_v43 = vpop.f32.mrb[27].mxu0  ;;  %v1216_v44 = vsel %vm593_vm2, %v1159_v38, -inf  ;;  %v2620_v41 = vld [vmem:[#allocation10 + $0x8] sm:$0xff]  }
 0x7b6   :  { %1217 = vmax.xlane.f32.xlu0 %v1216_v44 }
 0x7b7   :  { %v1219_v46 = vsel %vm593_vm2, %v1162_v42, -inf  ;;  %2477 = vmatpush3.bf16.msra.mxu1 %v2618_v61 }
 0x7b8   :  { %2482 = vmatprep.subr.bf16.mxu1 %v2619_v62 }
 0x7ba   :  { %1220 = vmax.xlane.f32.xlu0 %v1219_v46  ;;  %v1209_v48 = vpop.f32.mrb[28].mxu0 }
 0x7bb   :  { %v1210_v49 = vadd.f32 %v1209_v48, %v3215_v63  ;;  %v2500_v50 = vpop.f32.mrb[29].mxu0 }
 0x7bc   :  { %v1212_v51 = vpop.f32.mrb[30].mxu0 }
 0x7bd   :  { %v1213_v52 = vadd.f32 %v1212_v51, %v3218_v4  ;;  %v2501_v53 = vpop.f32.mrb[31].mxu0  ;;  %v1222_v57 = vsel %vm593_vm2, %v1210_v49, -inf }
 0x7be   :  { %1223 = vmax.xlane.f32.xlu0 %v1222_v57 }
 0x7bf   :  { %v1225_v58 = vsel %vm593_vm2, %v1213_v52, -inf }
 0x7c2   :  { %1226 = vmax.xlane.f32.xlu0 %v1225_v58 }
 0x843   :  { %v1218_v1 = vpop.xlane.xlu0 %1217 }
 0x844   :  { %v1228_v3 = vsub.f32 %v1159_v38, %v1218_v1 }
 0x846   :  { %v1232_v7 = vmul.f32 1.442695, %v1228_v3 }
 0x847   :  { %v1221_v8 = vpop.xlane.xlu0 %1220 }
 0x848   :  { %2705 = vpow2.f32 %v1232_v7  ;;  %v1229_v9 = vsub.f32 %v1162_v42, %v1221_v8 }
 0x84a   :  { %v1234_v10 = vmul.f32 1.442695, %v1229_v9 }
 0x84b   :  { %v1224_v11 = vpop.xlane.xlu0 %1223 }
 0x84c   :  { %2707 = vpow2.f32 %v1234_v10  ;;  %v1230_v12 = vsub.f32 %v1210_v49, %v1224_v11 }
 0x84e   :  { %v1236_v14 = vmul.f32 1.442695, %v1230_v12 }
 0x84f   :  { %v1227_v15 = vpop.xlane.xlu0 %1226 }
 0x850   :  { %2709 = vpow2.f32 %v1236_v14  ;;  %v1231_v16 = vsub.f32 %v1213_v52, %v1227_v15  ;;  %v2622_v52 = vld [vmem:[#allocation10 + $0x28] sm:$0xff]  }
 0x852   :  { %v2706_v17 = vpop.eup %2705  ;;  %v1238_v18 = vmul.f32 1.442695, %v1231_v16 }
 0x853   :  { %v1240_v13 = vsel %vm593_vm2, %v2706_v17, 0.0 }
 0x854   :  { %2711 = vpow2.f32 %v1238_v18  ;;  %1241 = vadd.xlane.f32.xlu1 %v1240_v13 }
 0x856   :  { %v2708_v20 = vpop.eup %2707 }
 0x857   :  { %v1243_v23 = vsel %vm593_vm2, %v2708_v20, 0.0 }
 0x858   :  { %1244 = vadd.xlane.f32.xlu0 %v1243_v23 }
 0x85a   :  { %v2710_v24 = vpop.eup %2709 }
 0x85b   :  { %v1246_v26 = vsel %vm593_vm2, %v2710_v24, 0.0 }
 0x85c   :  { %1247 = vadd.xlane.f32.xlu0 %v1246_v26 }
 0x85e   :  { %v2712_v28 = vpop.eup %2711 }
 0x85f   :  { %v1249_v30 = vsel %vm593_vm2, %v2712_v28, 0.0 }
 0x860   :  { %1250 = vadd.xlane.f32.xlu0 %v1249_v30 }
 0x865   :  { %1309 = vrot.lane.b32.xlu1 %v3191_v45, %s2962_s2 }
 0x876   :  { %1262 = vrot.lane.b32.xlu0 %v3193_v47, %s2962_s2 }
 0x87a   :  { %1431 = vrot.lane.b32.xlu0 %v3187_v35, %s2969_s11 }
 0x87e   :  { %1482 = vrot.lane.b32.xlu0 %v3198_v55, %s2969_s11 }
 0x882   :  { %1429 = vrot.lane.b32.xlu0 %v3185_v33, %s2969_s11 }
 0x885   :  { %v923_v34 = vpop.f32.mrb[16].mxu1 }
 0x886   :  { %v2466_v36 = vpop.f32.mrb[17].mxu1  ;;  %1480 = vrot.lane.b32.xlu0 %v3196_v54, %s2969_s11 }
 0x887   :  { %v926_v37 = vpop.f32.mrb[18].mxu1 }
 0x888   :  { %v978_v38 = vpack.c.bf16 %v926_v37, %v923_v34  ;;  %v2467_v40 = vpop.f32.mrb[19].mxu1 }
 0x88a   :  { %2478 = vmatprep.mubr.msk.bf16.mxu1 %vm498_vm1, %v978_v38 }
 0x88b   :  { %2479 = vmatmul.mubr.msk.bf16.vlgmr.msra.gmra.mrb[20].mxu1 %vm498_vm1, %v979_v27 }
 0x88c   :  { %2486 = vmatprep.mubr.msk.bf16.mxu1 %vm498_vm1, %v728_v32  ;;  %2483 = vmatpush3.bf16.msra.mxu1 %v2619_v62  ;;  %v2621_v32 = vld [vmem:[#allocation10 + $0x20] sm:$0xff]  }
 0x88d   :  { %2484 = vmatprep.subr.bf16.mxu1 %v2620_v41 }
 0x890   :  { %2485 = vmatpush3.bf16.msra.mxu1 %v2620_v41 }
 0x891   :  { %2502 = vmatprep.subr.bf16.mxu1 %v2966_v19 }
 0x897   :  { %2487 = vmatmul.mubr.msk.bf16.vlgmr.msra.gmra.mrb[20].mxu1 %vm498_vm1, %v729_v6 }
 0x898   :  { %2504 = vmatprep.mubr.msk.bf16.mxu1 %vm2967_vm0, %v2966_v19 }
 0x8e1   :  { %v1242_v33 = vpop.xlane.xlu1 %1241 }
 0x8e2   :  { %2713 = vrcp.f32 %v1242_v33 }
 0x8e5   :  { %v1310_v35 = vpop.permute.xlu1 %1309  ;;  %v1245_v54 = vpop.xlane.xlu0 %1244 }
 0x8e6   :  { %2715 = vrcp.f32 %v1245_v54  ;;  %2509 = vmatpush3.bf16.msra.mxu0 %v1310_v35 }
 0x8e7   :  { %2522 = vmatprep.subr.bf16.mxu0 %v2966_v19 }
 0x8e9   :  { %v1248_v55 = vpop.xlane.xlu0 %1247 }
 0x8ea   :  { %2717 = vrcp.f32 %v1248_v55 }
 0x8ec   :  { %v2714_v31 = vpop.eup %2713 }
 0x8ed   :  { %v1251_v29 = vpop.xlane.xlu0 %1250  ;;  %v1253_v5 = vmul.f32 %v2714_v31, %v2706_v17 }
 0x8ee   :  { %2719 = vrcp.f32 %v1251_v29 }
 0x8f0   :  { %v2716_v2 = vpop.eup %2715 }
 0x8f1   :  { %v1255_v6 = vmul.f32 %v2716_v2, %v2708_v20  ;;  %v1263_v22 = vpop.permute.xlu0 %1262 }
 0x8f2   :  { %2503 = vmatpush3.bf16.msra.mxu1 %v1263_v22 }
 0x8f3   :  { %v1260_v25 = vpack.c.bf16 %v1255_v6, %v1253_v5  ;;  %2514 = vmatprep.subr.bf16.mxu1 %v2621_v32 }
 0x8f4   :  { %v2718_v27 = vpop.eup %2717 }
 0x8f5   :  { %2505 = vmatmul.mubr.msk.bf16.vlgmr.msra.gmra.mrb[24].mxu1 %vm593_vm2, %v1260_v25  ;;  %v1432_v43 = vpop.permute.xlu0 %1431  ;;  %v1257_v44 = vmul.f32 %v2718_v27, %v2710_v24 }
 0x8f6   :  { %2515 = vmatpush3.bf16.msra.mxu1 %v2621_v32  ;;  %v1437_v49 = vsel %vm498_vm1, %v1432_v43, 0 }
 0x8f7   :  { %2516 = vmatprep.subr.bf16.mxu1 %v2622_v52 }
 0x8f8   :  { %v2720_v42 = vpop.eup %2719 }
 0x8f9   :  { %v1259_v46 = vmul.f32 %v2720_v42, %v2712_v28  ;;  %v1483_v50 = vpop.permute.xlu0 %1482 }
 0x8fa   :  { %2517 = vmatpush3.bf16.msra.mxu1 %v2622_v52  ;;  %v1488_v9 = vsel %vm498_vm1, %v1483_v50, 0 }
 0x8fb   :  { %v1261_v48 = vpack.c.bf16 %v1259_v46, %v1257_v44  ;;  %2528 = vmatprep.subr.bf16.mxu1 %v2966_v19 }
 0x8fd   :  { %2511 = vmatmul.mubr.msk.bf16.vlgmr.msra.gmra.mrb[32].mxu0 %vm593_vm2, %v1261_v48  ;;  %v1430_v51 = vpop.permute.xlu0 %1429 }
 0x8fe   :  { %2523 = vmatpush3.bf16.xpose.msra.mxu0 %v1437_v49  ;;  %2524 = vmatprep.mubr.msk.bf16.mxu0 %vm2967_vm0, %v2966_v19 }
 0x8ff   :  { %2534 = vmatprep.subr.bf16.mxu0 %v2966_v19 }
 0x901   :  { %v1481_v18 = vpop.permute.xlu0 %1480 }
 0x905   :  { %2525 = vmatmul.mubr.msk.bf16.vlgmr.msra.gmra.mrb[36].mxu0 %vm498_vm1, %v1430_v51 }
 0x906   :  { %2536 = vmatprep.mubr.msk.bf16.mxu0 %vm2967_vm0, %v2966_v19 }
 0x9c8   :  { %v1302_v53 = vpop.f32.mrb[24].mxu1 }
 0x9c9   :  { %v2506_v57 = vpop.f32.mrb[25].mxu1 }
 0x9ca   :  { %v1305_v58 = vpop.f32.mrb[26].mxu1 }
 0x9cb   :  { %v1356_v60 = vpack.c.bf16 %v1305_v58, %v1302_v53  ;;  %v2507_v61 = vpop.f32.mrb[27].mxu1 }
 0x9cd   :  { %2518 = vmatprep.mubr.msk.bf16.mxu1 %vm498_vm1, %v1356_v60 }
 0x9d0   :  { %v1349_v62 = vpop.f32.mrb[32].mxu0 }
 0x9d1   :  { %v2512_v1 = vpop.f32.mrb[33].mxu0 }
 0x9d2   :  { %v1352_v3 = vpop.f32.mrb[34].mxu0  ;;  %v2624_v1 = vld [vmem:[#allocation10 + $0x38] sm:$0xff]  }
 0x9d3   :  { %v1357_v7 = vpack.c.bf16 %v1352_v3, %v1349_v62  ;;  %v2513_v8 = vpop.f32.mrb[35].mxu0  ;;  %v2623_v62 = vld [vmem:[#allocation10 + $0x30] sm:$0xff]  }
 0x9d5   :  { %2519 = vmatmul.mubr.msk.bf16.vlgmr.msra.gmra.mrb[20].mxu1 %vm498_vm1, %v1357_v7 }
 0x9d6   :  { %2529 = vmatpush3.bf16.xpose.msra.mxu1 %v1488_v9  ;;  %2530 = vmatprep.mubr.msk.bf16.mxu1 %vm2967_vm0, %v2966_v19 }
 0x9d7   :  { %2540 = vmatprep.subr.bf16.mxu1 %v2966_v19 }
 0x9d8   :  { %v1473_v10 = vpop.f32.mrb[36].mxu0 }
 0x9d9   :  { %v1474_v11 = vadd.f32 %v1473_v10, %v3215_v63  ;;  %v2526_v12 = vpop.f32.mrb[37].mxu0 }
 0x9da   :  { %v1476_v14 = vpop.f32.mrb[38].mxu0 }
 0x9db   :  { %v1477_v15 = vadd.f32 %v1476_v14, %v3218_v4  ;;  %v2527_v16 = vpop.f32.mrb[39].mxu0  ;;  %v1531_v17 = vsel %vm593_vm2, %v1474_v11, -inf }
 0x9dc   :  { %1532 = vmax.xlane.f32.xlu0 %v1531_v17  ;;  %v1750_v17 = vsub.s32 4, %v3156_v56 }
 0x9dd   :  { %2531 = vmatmul.mubr.msk.bf16.vlgmr.msra.gmra.mrb[28].mxu1 %vm498_vm1, %v1481_v18  ;;  %v1534_v13 = vsel %vm593_vm2, %v1477_v15, -inf }
 0x9de   :  { %1535 = vmax.xlane.f32.xlu1 %v1534_v13  ;;  %2542 = vmatprep.mubr.msk.bf16.mxu1 %vm2967_vm0, %v2966_v19  ;;  %v3394_v13 = vld [vmem:[#allocation7] sm:$0x3f] }
 0xa69   :  { %v1533_v20 = vpop.xlane.xlu0 %1532 }
 0xa6a   :  { %v1543_v23 = vsub.f32 %v1474_v11, %v1533_v20  ;;  %v1751_v20 = vrot.slane %v3394_v13, %v1750_v17 }
 0xa6b   :  { %v1536_v30 = vpop.xlane.xlu1 %1535 }
 0xa6c   :  { %v1547_v24 = vmul.f32 1.442695, %v1543_v23  ;;  %v1544_v34 = vsub.f32 %v1477_v15, %v1536_v30 }
 0xa6e   :  { %2721 = vpow2.f32 %v1547_v24  ;;  %v1549_v36 = vmul.f32 1.442695, %v1544_v34  ;;  %v2762_v24 = vld [vmem:[#allocation2] sm:$0xff]  ;;  %v2763_v34 = vld [vmem:[#allocation2 + $0x10] sm:$0xff] }
 0xa70   :  { %2723 = vpow2.f32 %v1549_v36 }
 0xa78   :  { %v2722_v26 = vpop.eup %2721 }
 0xa79   :  { %v1555_v28 = vsel %vm593_vm2, %v2722_v26, 0.0 }
 0xa7a   :  { %1556 = vadd.xlane.f32.xlu1 %v1555_v28  ;;  %v2724_v55 = vpop.eup %2723 }
 0xa7b   :  { %v1558_v29 = vsel %vm593_vm2, %v2724_v55, 0.0 }
 0xab0   :  { %v1524_v37 = vpop.f32.mrb[28].mxu1 }
 0xab1   :  { %v1525_v38 = vadd.f32 %v1524_v37, %v3215_v63  ;;  %v2532_v40 = vpop.f32.mrb[29].mxu1 }
 0xab2   :  { %v1527_v41 = vpop.f32.mrb[30].mxu1 }
 0xab3   :  { %v1528_v33 = vadd.f32 %v1527_v41, %v3218_v4  ;;  %v2533_v19 = vpop.f32.mrb[31].mxu1  ;;  %v1537_v35 = vsel %vm593_vm2, %v1525_v38, -inf  ;;  %v2765_v41 = vld [vmem:[#allocation2 + $0x18] sm:$0xff] }
 0xab4   :  { %1538 = vmax.xlane.f32.xlu0 %v1537_v35 }
 0xab5   :  { %v1540_v54 = vsel %vm593_vm2, %v1528_v33, -inf }
 0xab8   :  { %1541 = vmax.xlane.f32.xlu0 %v1540_v54 }
 0xabc   :  { %1559 = vadd.xlane.f32.xlu0 %v1558_v29  ;;  %v2627_v29 = vld [vmem:[#allocation11 + $0x4] ss:$8 sps:$4 sm:$0xff]  }
 0xb07   :  { %v1557_v43 = vpop.xlane.xlu1 %1556 }
 0xb41   :  { %v1539_v31 = vpop.xlane.xlu0 %1538 }
 0xb42   :  { %v1545_v32 = vsub.f32 %v1525_v38, %v1539_v31  ;;  %v2764_v38 = vld [vmem:[#allocation2 + $0x8] sm:$0xff] }
 0xb43   :  { %v2630_v31 = vld [vmem:[#allocation11 + $0x14] ss:$8 sps:$4 sm:$0xff]  }
 0xb44   :  { %v1551_v2 = vmul.f32 1.442695, %v1545_v32  ;;  %v2628_v32 = vld [vmem:[#allocation11 + $0x10] ss:$8 sps:$4 sm:$0xff]  }
 0xb45   :  { %v1542_v5 = vpop.xlane.xlu0 %1541 }
 0xb46   :  { %2725 = vpow2.f32 %v1551_v2  ;;  %v1546_v63 = vsub.f32 %v1528_v33, %v1542_v5 }
 0xb48   :  { %v1553_v6 = vmul.f32 1.442695, %v1546_v63 }
 0xb49   :  { %v1560_v42 = vpop.xlane.xlu0 %1559 }
 0xb4a   :  { %2727 = vpow2.f32 %v1553_v6 }
 0xb4b   :  { %2729 = vrcp.f32 %v1560_v42 }
 0xb4c   :  { %2731 = vrcp.f32 %v1557_v43 }
 0xb50   :  { %v2726_v4 = vpop.eup %2725 }
 0xb51   :  { %v1561_v22 = vsel %vm593_vm2, %v2726_v4, 0.0 }
 0xb52   :  { %1562 = vadd.xlane.f32.xlu1 %v1561_v22 }
 0xb54   :  { %v2728_v25 = vpop.eup %2727 }
 0xb55   :  { %v1564_v27 = vsel %vm593_vm2, %v2728_v25, 0.0  ;;  %v2730_v44 = vpop.eup %2729 }
 0xb56   :  { %1565 = vadd.xlane.f32.xlu0 %v1564_v27  ;;  %v2732_v48 = vpop.eup %2731  ;;  %v1570_v49 = vmul.f32 %v2730_v44, %v2724_v55  ;;  %v2625_v55 = vld [vmem:[#allocation11] ss:$8 sps:$4 sm:$0xff]  }
 0xb57   :  { %v1568_v50 = vmul.f32 %v2732_v48, %v2722_v26 }
 0xb59   :  { %v1575_v53 = vpack.c.bf16 %v1570_v49, %v1568_v50 }
 0xb63   :  { %1577 = vrot.lane.b32.xlu1 %v3193_v47, %s2969_s11 }
 0xb6c   :  { %1624 = vrot.lane.b32.xlu0 %v3191_v45, %s2969_s11 }
 0xbdf   :  { %v1563_v46 = vpop.xlane.xlu1 %1562 }
 0xbe0   :  { %2733 = vrcp.f32 %v1563_v46 }
 0xbe3   :  { %v1566_v51 = vpop.xlane.xlu0 %1565  ;;  %v1578_v52 = vpop.permute.xlu1 %1577 }
 0xbe4   :  { %2735 = vrcp.f32 %v1566_v51  ;;  %2535 = vmatpush3.bf16.msra.mxu0 %v1578_v52  ;;  %v2633_v52 = vld [vmem:[#allocation11 + $0x24] ss:$8 sps:$4 sm:$0xff]  }
 0xbe5   :  { %1926 = vmatprep.subr.bf16.mxu0 %v2627_v29 }
 0xbe7   :  { %v1625_v57 = vpop.permute.xlu0 %1624  ;;  %2537 = vmatmul.mubr.msk.bf16.vlgmr.msra.gmra.mrb[40].mxu0 %vm593_vm2, %v1575_v53  ;;  %v2631_v53 = vld [vmem:[#allocation11 + $0x20] ss:$8 sps:$4 sm:$0xff]  }
 0xbe8   :  { %2541 = vmatpush3.bf16.msra.mxu1 %v1625_v57  ;;  %1958 = vmatprep.mubr.bf16.mxu0 %v2965_v39  ;;  %v2636_v57 = vld [vmem:[#allocation11 + $0x34] ss:$8 sps:$4 sm:$0xff]  }
 0xbe9   :  { %2546 = vmatprep.subr.bf16.mxu1 %v2623_v62  ;;  %1927 = vmatpush1.bf16.msra.mxu0 %v2625_v55 }
 0xbea   :  { %v2734_v45 = vpop.eup %2733  ;;  %1928 = vmatprep.subr.bf16.mxu0 %v2630_v31 }
 0xbeb   :  { %v1572_v58 = vmul.f32 %v2734_v45, %v2726_v4  ;;  %v2634_v45 = vld [vmem:[#allocation11 + $0x30] ss:$8 sps:$4 sm:$0xff]  }
 0xbed   :  { %1929 = vmatpush1.bf16.msra.mxu0 %v2628_v32 }
 0xbee   :  { %v2736_v47 = vpop.eup %2735  ;;  %1930 = vmatprep.subr.bf16.mxu0 %v2633_v52  ;;  %v2659_v52 = vld [vmem:[#allocation13 + $0x68] sm:$0xff]  }
 0xbef   :  { %v1574_v60 = vmul.f32 %v2736_v47, %v2728_v25  ;;  %v2639_v47 = vld [vmem:[#allocation11 + $0x44] ss:$8 sps:$4 sm:$0xff]  }
 0xbf1   :  { %v1576_v61 = vpack.c.bf16 %v1574_v60, %v1572_v58  ;;  %1931 = vmatpush1.bf16.msra.mxu0 %v2631_v53  ;;  %v2637_v58 = vld [vmem:[#allocation11 + $0x40] ss:$8 sps:$4 sm:$0xff]   ;;  %v2642_v60 = vld [vmem:[#allocation11 + $0x54] ss:$8 sps:$4 sm:$0xff]  }
 0xbf2   :  { %1932 = vmatprep.subr.bf16.mxu0 %v2636_v57  ;;  %v2660_v53 = vld [vmem:[#allocation13 + $0x28] sm:$0xff]   ;;  %v2662_v57 = vld [vmem:[#allocation13 + $0x30] sm:$0xff]  }
 0xbf3   :  { %2543 = vmatmul.mubr.msk.bf16.vlgmr.msra.gmra.mrb[32].mxu1 %vm593_vm2, %v1576_v61  ;;  %v2640_v61 = vld [vmem:[#allocation11 + $0x50] ss:$8 sps:$4 sm:$0xff]  }
 0xbf4   :  { %2547 = vmatpush3.bf16.msra.mxu1 %v2623_v62  ;;  %v2645_v62 = vld [vmem:[#allocation11 + $0x64] ss:$8 sps:$4 sm:$0xff]  }
 0xbf5   :  { %2548 = vmatprep.subr.bf16.mxu1 %v2624_v1  ;;  %1933 = vmatpush1.bf16.msra.mxu0 %v2634_v45  ;;  %v2663_v45 = vld [vmem:[#allocation13 + $0x78] sm:$0xff]  }
 0xbf6   :  { %1934 = vmatprep.subr.bf16.mxu0 %v2639_v47  ;;  %v2664_v47 = vld [vmem:[#allocation13 + $0x38] sm:$0xff]  }
 0xbf8   :  { %2549 = vmatpush3.bf16.msra.mxu1 %v2624_v1  ;;  %v2643_v1 = vld [vmem:[#allocation11 + $0x60] ss:$8 sps:$4 sm:$0xff]  }
 0xbf9   :  { %1935 = vmatpush1.bf16.msra.mxu0 %v2637_v58  ;;  %v1834_v58 = vld [vmem:[%s3472_s7] sm:$0x3]  ;;  %s2970_s7 = smov [#allocation14]  }
 0xbfa   :  { %1936 = vmatprep.subr.bf16.mxu0 %v2642_v60  ;;  %v1839_v60 = vrot.slane %v1834_v58, %v3159_v59  ;;  %s2217_s10 = sshll.u32 %s2970_s7, 4  ;;  %s2218_s10 = int_to_ptr.vmem [resolvable:$true] %s2217_s10 }
 0xbfb   :  { %s2920_s14 = scalar_lea.vmem %s2218_s10, 512  ;;  %p2925_p1 = scmp.lt.s32.totalorder %s2218_s10, %s2218_s10 }
 0xbfc   :  { %p2921_p0 = scmp.ne.s32.totalorder %s2218_s10, %s2920_s14  ;;  %p2926_p2 = scmp.lt.s32.totalorder %s2920_s14, %s2920_s14 }
 0xbfd   :  { %1937 = vmatpush1.bf16.msra.mxu0 %v2640_v61  ;;  %v1843_v61 = vrot.slane %v1834_v58, %v3164_v0 }
 0xbfe   :  { %1938 = vmatprep.subr.bf16.mxu0 %v2645_v62  ;;  %p2927_p3 = por %p2926_p2, %p2925_p1 }
 0xc00   :  { %p2928_p4 = pnand %p2927_p3, %p2921_p0 }
 0xc01   :  { %1939 = vmatpush1.bf16.msra.mxu0 %v2643_v1 }
 0xcba   :  { %v1617_v3 = vpop.f32.mrb[40].mxu0 }
 0xcbb   :  { %v2538_v7 = vpop.f32.mrb[41].mxu0 }
 0xcbc   :  { %v1620_v8 = vpop.f32.mrb[42].mxu0  ;;  %v2646_v7 = vld [vmem:[#allocation11 + $0x70] ss:$8 sps:$4 sm:$0xff]  }
 0xcbd   :  { %v1671_v9 = vpack.c.bf16 %v1620_v8, %v1617_v3  ;;  %v2539_v10 = vpop.f32.mrb[43].mxu0  ;;  %v2648_v3 = vld [vmem:[#allocation11 + $0x74] ss:$8 sps:$4 sm:$0xff]   ;;  %v2649_v8 = vld [vmem:[#allocation13 + $0x40] sm:$0xff]  }
 0xcbe   :  { %1940 = vmatprep.subr.bf16.mxu0 %v2648_v3  ;;  %v2651_v10 = vld [vmem:[#allocation13 + $0x48] sm:$0xff]   ;;  %2378 = vmatprep.subr.bf16.mxu1 %v2649_v8 }
 0xcbf   :  { %2550 = vmatprep.mubr.msk.bf16.mxu1 %vm498_vm1, %v1671_v9  ;;  %1941 = vmatpush1.bf16.msra.mxu0 %v2646_v7  ;;  %v2650_v9 = vld [vmem:[#allocation13] sm:$0xff]  }
 0xcc6   :  { %v1664_v11 = vpop.f32.mrb[32].mxu1 }
 0xcc7   :  { %v2544_v12 = vpop.f32.mrb[33].mxu1 }
 0xcc8   :  { %v1667_v14 = vpop.f32.mrb[34].mxu1 }
 0xcc9   :  { %v1672_v15 = vpack.c.bf16 %v1667_v14, %v1664_v11  ;;  %v2545_v16 = vpop.f32.mrb[35].mxu1  ;;  %v2652_v11 = vld [vmem:[#allocation13 + $0x8] sm:$0xff]  }
 0xccb   :  { %2551 = vmatmul.mubr.msk.bf16.vlgmr.msra.gmra.mrb[20].mxu1 %vm498_vm1, %v1672_v15 }
 0xccc   :  { %2379 = vmatpush3.bf16.msra.mxu1 %v2650_v9 }
 0xccd   :  { %2380 = vmatprep.subr.bf16.mxu1 %v2651_v10 }
 0xcd0   :  { %2381 = vmatpush3.bf16.msra.mxu1 %v2652_v11 }
 0xd9e   :  { %v2552_v18 = vpop.f32.mrb[20].mxu1 }
 0xd9f   :  { %v1725_v23 = vpop.f32.mrb[21].mxu1  ;;  %v1746_v36 = vadd.f32 %v2763_v34, %v2552_v18  ;;  %v1803_v34 = vrot.slane %v3394_v13, %v241_v21 }
 0xda0   :  { %v1744_v26 = vadd.f32 %v2762_v24, %v1725_v23  ;;  %v2553_v28 = vpop.f32.mrb[22].mxu1 }
 0xda1   :  { %v1728_v30 = vpop.f32.mrb[23].mxu1  ;;  %v1747_v33 = vadd.f32 %v2765_v41, %v2553_v28  ;;  %v3402_v35 = vadd.f32 %v1751_v20, %v1746_v36  ;;  %v1810_v36 = vsub.s32 3, %v3156_v56 }
 0xda2   :  { %v3397_v37 = vadd.f32 %v1751_v20, %v1744_v26  ;;  %v1745_v40 = vadd.f32 %v2764_v38, %v1728_v30 }
 0xda3   :  { %v3405_v54 = vadd.f32 %v1751_v20, %v1747_v33  ;;  %v1811_v29 = vrot.slane %v3394_v13, %v1810_v36 }
 0xda4   :  { %v3399_v19 = vadd.f32 %v1751_v20, %v1745_v40  ;;  %1756 = vadd.xlane.f32.xlu1 %v3397_v37 }
 0xda6   :  { %1758 = vadd.xlane.f32.xlu0 %v3399_v19 }
 0xda8   :  { %1760 = vadd.xlane.f32.xlu1 %v3402_v35 }
 0xdaa   :  { %1762 = vadd.xlane.f32.xlu0 %v3405_v54 }
 0xe31   :  { %v1757_v2 = vpop.xlane.xlu1 %1756 }
 0xe32   :  { %v1764_v5 = vmul.f32 0.0078125, %v1757_v2 }
 0xe33   :  { %v1759_v63 = vpop.xlane.xlu0 %1758 }
 0xe34   :  { %v3410_v6 = vsub.f32 %v3397_v37, %v1764_v5  ;;  %v1765_v4 = vmul.f32 0.0078125, %v1759_v63 }
 0xe35   :  { %v1761_v22 = vpop.xlane.xlu1 %1760 }
 0xe36   :  { %v3413_v25 = vsub.f32 %v3399_v19, %v1765_v4  ;;  %v1766_v27 = vmul.f32 0.0078125, %v1761_v22  ;;  %v1772_v42 = vmul.f32 %v3410_v6, %v3410_v6 }
 0xe37   :  { %v1763_v43 = vpop.xlane.xlu0 %1762 }
 0xe38   :  { %v3418_v44 = vsub.f32 %v3402_v35, %v1766_v27  ;;  %v1767_v46 = vmul.f32 0.0078125, %v1763_v43  ;;  %1776 = vadd.xlane.f32.xlu1 %v1772_v42  ;;  %v1773_v48 = vmul.f32 %v3413_v25, %v3413_v25 }
 0xe3a   :  { %v3423_v49 = vsub.f32 %v3405_v54, %v1767_v46  ;;  %1778 = vadd.xlane.f32.xlu0 %v1773_v48  ;;  %v1774_v50 = vmul.f32 %v3418_v44, %v3418_v44  ;;  %v2653_v46 = vld [vmem:[#allocation13 + $0x50] sm:$0xff]  }
 0xe3b   :  { %v2654_v48 = vld [vmem:[#allocation13 + $0x10] sm:$0xff]   ;;  %2382 = vmatprep.subr.bf16.mxu1 %v2653_v46 }
 0xe3c   :  { %1780 = vadd.xlane.f32.xlu1 %v1774_v50  ;;  %v1775_v51 = vmul.f32 %v3423_v49, %v3423_v49  ;;  %2383 = vmatpush3.bf16.msra.mxu1 %v2654_v48  ;;  %v2655_v50 = vld [vmem:[#allocation13 + $0x58] sm:$0xff]  }
 0xe3d   :  { %2384 = vmatprep.subr.bf16.mxu1 %v2655_v50 }
 0xe3e   :  { %1782 = vadd.xlane.f32.xlu0 %v1775_v51  ;;  %v2656_v51 = vld [vmem:[#allocation13 + $0x18] sm:$0xff]  }
 0xe40   :  { %2385 = vmatpush3.bf16.msra.mxu1 %v2656_v51 }
 0xec5   :  { %v1777_v12 = vpop.xlane.xlu1 %1776 }
 0xec6   :  { %v1784_v14 = vmul.f32 0.0078125, %v1777_v12 }
 0xec7   :  { %v1779_v15 = vpop.xlane.xlu0 %1778 }
 0xec8   :  { %v1788_v16 = vadd.f32 1e-05, %v1784_v14  ;;  %v1785_v17 = vmul.f32 0.0078125, %v1779_v15 }
 0xec9   :  { %v1781_v18 = vpop.xlane.xlu1 %1780 }
 0xeca   :  { %2737 = vrsqrt.f32 %v1788_v16  ;;  %v1789_v20 = vadd.f32 1e-05, %v1785_v17  ;;  %v1786_v23 = vmul.f32 0.0078125, %v1781_v18 }
 0xecb   :  { %v1783_v24 = vpop.xlane.xlu0 %1782 }
 0xecc   :  { %2739 = vrsqrt.f32 %v1789_v20  ;;  %v1790_v26 = vadd.f32 1e-05, %v1786_v23  ;;  %v1787_v28 = vmul.f32 0.0078125, %v1783_v24 }
 0xece   :  { %2741 = vrsqrt.f32 %v1790_v26  ;;  %v1791_v30 = vadd.f32 1e-05, %v1787_v28 }
 0xed0   :  { %2743 = vrsqrt.f32 %v1791_v30 }
 0xed4   :  { %v2738_v38 = vpop.eup %2737 }
 0xed5   :  { %v1796_v40 = vmul.f32 %v2738_v38, %v3410_v6 }
 0xed6   :  { %v2740_v41 = vpop.eup %2739 }
 0xed7   :  { %v1797_v33 = vmul.f32 %v2740_v41, %v3413_v25  ;;  %v1804_v55 = vmul.f32 %v1803_v34, %v1796_v40 }
 0xed8   :  { %v2742_v31 = vpop.eup %2741 }
 0xed9   :  { %v1805_v32 = vmul.f32 %v1803_v34, %v1797_v33  ;;  %v1812_v5 = vadd.f32 %v1811_v29, %v1804_v55  ;;  %v1798_v4 = vmul.f32 %v2742_v31, %v3418_v44  ;;  %v2657_v44 = vld [vmem:[#allocation13 + $0x60] sm:$0xff]  }
 0xeda   :  { %v2744_v2 = vpop.eup %2743  ;;  %2386 = vmatprep.subr.bf16.mxu1 %v2657_v44 }
 0xedb   :  { %v1813_v63 = vadd.f32 %v1811_v29, %v1805_v32  ;;  %v1799_v21 = vmul.f32 %v2744_v2, %v3423_v49  ;;  %v1806_v42 = vmul.f32 %v1803_v34, %v1798_v4  ;;  %v2658_v49 = vld [vmem:[#allocation13 + $0x20] sm:$0xff]  }
 0xedc   :  { %2387 = vmatpush3.bf16.msra.mxu1 %v2658_v49 }
 0xedd   :  { %v1816_v22 = vpack.c.bf16 %v1813_v63, %v1812_v5  ;;  %v1807_v27 = vmul.f32 %v1803_v34, %v1799_v21  ;;  %v1814_v25 = vadd.f32 %v1811_v29, %v1806_v42  ;;  %2388 = vmatprep.subr.bf16.mxu1 %v2659_v52 }
 0xedf   :  { %1959 = vmatmul.mubr.bf16.vlgmr.msra.gmra.mrb[44].mxu0 %v1816_v22  ;;  %v1815_v6 = vadd.f32 %v1811_v29, %v1807_v27 }
 0xee0   :  { %1968 = vmatprep.mubr.bf16.mxu0 %v2965_v39  ;;  %2389 = vmatpush3.bf16.msra.mxu1 %v2660_v53  ;;  %v2661_v39 = vld [vmem:[#allocation13 + $0x70] sm:$0xff]  }
 0xee1   :  { %v1817_v43 = vpack.c.bf16 %v1815_v6, %v1814_v25  ;;  %2390 = vmatprep.subr.bf16.mxu1 %v2661_v39 }
 0xee4   :  { %2391 = vmatpush3.bf16.msra.mxu1 %v2662_v57 }
 0xee5   :  { %2392 = vmatprep.subr.bf16.mxu1 %v2663_v45 }
 0xee7   :  { %1969 = vmatmul.mubr.bf16.gmra.mrb[48].mxu0 %v1817_v43 }
 0xee8   :  { %2393 = vmatpush3.bf16.msra.mxu1 %v2664_v47 }
 0xfb2   :  { %v1960_v62 = vpop.f32.mrb[44].mxu0 }
 0xfb3   :  { %v1961_v1 = vadd.f32 %v1960_v62, %v1839_v60  ;;  %v1962_v3 = vpop.f32.mrb[45].mxu0 }
 0xfb4   :  { %v1963_v7 = vadd.f32 %v1962_v3, %v1843_v61  ;;  %v1964_v8 = vpop.f32.mrb[46].mxu0  ;;  %v2057_v3 = vsub.s32 5, %v3156_v56 }
 0xfb5   :  { %v1987_v9 = vmul.f32 0.70710677, %v1961_v1  ;;  %v1965_v10 = vadd.f32 %v1964_v8, %v1839_v60  ;;  %v1966_v11 = vpop.f32.mrb[47].mxu0  ;;  %v1979_v31 = vmul.f32 0.5, %v1961_v1 }
 0xfb6   :  { %v1988_v12 = vmul.f32 0.70710677, %v1963_v7  ;;  %v1967_v14 = vadd.f32 %v1966_v11, %v1843_v61  ;;  %v1980_v5 = vmul.f32 0.5, %v1963_v7  ;;  %v2058_v8 = vrot.slane %v3394_v13, %v2057_v3 }
 0xfb7   :  { %2745 = verf.f32 %v1987_v9  ;;  %v1989_v15 = vmul.f32 0.70710677, %v1965_v10  ;;  %v1981_v32 = vmul.f32 0.5, %v1965_v10 }
 0xfb8   :  { %2747 = verf.f32 %v1988_v12  ;;  %v1990_v16 = vmul.f32 0.70710677, %v1967_v14  ;;  %v1982_v63 = vmul.f32 0.5, %v1967_v14 }
 0xfb9   :  { %2749 = verf.f32 %v1989_v15 }
 0xfba   :  { %2751 = verf.f32 %v1990_v16  ;;  %v1970_v17 = vpop.f32.mrb[48].mxu0 }
 0xfbb   :  { %v1971_v59 = vadd.f32 %v1970_v17, %v1839_v60  ;;  %v1972_v18 = vpop.f32.mrb[49].mxu0 }
 0xfbc   :  { %v1973_v0 = vadd.f32 %v1972_v18, %v1843_v61  ;;  %v1974_v20 = vpop.f32.mrb[50].mxu0 }
 0xfbd   :  { %v1991_v23 = vmul.f32 0.70710677, %v1971_v59  ;;  %v1975_v24 = vadd.f32 %v1974_v20, %v1839_v60  ;;  %v1976_v26 = vpop.f32.mrb[51].mxu0  ;;  %v1983_v49 = vmul.f32 0.5, %v1971_v59 }
 0xfbe   :  { %v1992_v28 = vmul.f32 0.70710677, %v1973_v0  ;;  %v1977_v30 = vadd.f32 %v1976_v26, %v1843_v61  ;;  %v1984_v39 = vmul.f32 0.5, %v1973_v0 }
 0xfbf   :  { %2753 = verf.f32 %v1991_v23  ;;  %v1993_v34 = vmul.f32 0.70710677, %v1975_v24  ;;  %v1985_v52 = vmul.f32 0.5, %v1975_v24 }
 0xfc0   :  { %2755 = verf.f32 %v1992_v28  ;;  %v1994_v36 = vmul.f32 0.70710677, %v1977_v30  ;;  %v1986_v57 = vmul.f32 0.5, %v1977_v30 }
 0xfc1   :  { %v2746_v38 = vpop.eup %2745  ;;  %2757 = verf.f32 %v1993_v34 }
 0xfc2   :  { %v2748_v40 = vpop.eup %2747  ;;  %v2003_v41 = vadd.f32 1.0, %v2746_v38  ;;  %2759 = verf.f32 %v1994_v36 }
 0xfc3   :  { %v2750_v33 = vpop.eup %2749  ;;  %v2004_v55 = vadd.f32 1.0, %v2748_v40 }
 0xfc4   :  { %v2752_v29 = vpop.eup %2751  ;;  %v2005_v2 = vadd.f32 1.0, %v2750_v33  ;;  %v2011_v21 = vmul.f32 %v2003_v41, %v1979_v31 }
 0xfc5   :  { %v2006_v4 = vadd.f32 1.0, %v2752_v29  ;;  %v2012_v27 = vmul.f32 %v2004_v55, %v1980_v5 }
 0xfc6   :  { %v2013_v22 = vmul.f32 %v2005_v2, %v1981_v32 }
 0xfc7   :  { %v2014_v42 = vmul.f32 %v2006_v4, %v1982_v63 }
 0xfc8   :  { %v2019_v6 = vpack.c.bf16 %v2013_v22, %v2011_v21 }
 0xfc9   :  { %v2754_v25 = vpop.eup %2753  ;;  %v2020_v43 = vpack.c.bf16 %v2014_v42, %v2012_v27 }
 0xfca   :  { %v2756_v46 = vpop.eup %2755  ;;  %v2007_v48 = vadd.f32 1.0, %v2754_v25 }
 0xfcb   :  { %v2758_v50 = vpop.eup %2757  ;;  %v2008_v51 = vadd.f32 1.0, %v2756_v46  ;;  %2187 = vmatprep.mubr.bf16.mxu1 %v2020_v43 }
 0xfcc   :  { %v2760_v44 = vpop.eup %2759  ;;  %v2009_v53 = vadd.f32 1.0, %v2758_v50  ;;  %2188 = vmatmul.mubr.bf16.vlgmr.msra.gmra.mrb[36].mxu1 %v2019_v6  ;;  %v2015_v47 = vmul.f32 %v2007_v48, %v1983_v49 }
 0xfcd   :  { %v2010_v45 = vadd.f32 1.0, %v2760_v44  ;;  %v2016_v60 = vmul.f32 %v2008_v51, %v1984_v39 }
 0xfce   :  { %v2017_v58 = vmul.f32 %v2009_v53, %v1985_v52 }
 0xfcf   :  { %v2018_v61 = vmul.f32 %v2010_v45, %v1986_v57 }
 0xfd0   :  { %v2021_v62 = vpack.c.bf16 %v2017_v58, %v2015_v47 }
 0xfd1   :  { %v2022_v1 = vpack.c.bf16 %v2018_v61, %v2016_v60 }
 0xfd3   :  { %2195 = vmatprep.mubr.bf16.mxu1 %v2022_v1 }
 0xfd4   :  { %2196 = vmatmul.mubr.bf16.gmra.mrb[40].mxu1 %v2021_v62 }
0x109f   :  { %v2394_v7 = vpop.f32.mrb[36].mxu1 }
0x10a0   :  { %v2395_v9 = vpop.f32.mrb[37].mxu1 }
0x10a1   :  { %v2396_v10 = vadd.f32 %v2395_v9, %v2394_v7  ;;  %v2397_v11 = vpop.f32.mrb[38].mxu1 }
0x10a2   :  { %v2398_v12 = vpop.f32.mrb[39].mxu1 }
0x10a3   :  { %v2190_v14 = vadd.f32 %v2396_v10, %v2058_v8  ;;  %v2399_v15 = vadd.f32 %v2398_v12, %v2397_v11 }
0x10a5   :  { %v2204_v16 = vadd.f32 %v2190_v14, %v3397_v37  ;;  %v2193_v17 = vadd.f32 %v2399_v15, %v2058_v8 }
0x10a7   :  { %2208 = vst [vmem:[#allocation14] sm:$0xff] %v2204_v16  ;;  %v2205_v59 = vadd.f32 %v2193_v17, %v3399_v19  ;;  %v2400_v18 = vpop.f32.mrb[40].mxu1 }
0x10a8   :  { %v2401_v0 = vpop.f32.mrb[41].mxu1 }
0x10a9   :  { %2209 = vst [vmem:[#allocation14 + $0x8] sm:$0xff] %v2205_v59  ;;  %v2402_v20 = vadd.f32 %v2401_v0, %v2400_v18  ;;  %v2403_v56 = vpop.f32.mrb[42].mxu1 }
0x10aa   :  { %v2404_v23 = vpop.f32.mrb[43].mxu1 }
0x10ab   :  { %v2198_v24 = vadd.f32 %v2402_v20, %v2058_v8  ;;  %v2405_v13 = vadd.f32 %v2404_v23, %v2403_v56 }
0x10ad   :  { %v2206_v26 = vadd.f32 %v2198_v24, %v3402_v35  ;;  %v2201_v28 = vadd.f32 %v2405_v13, %v2058_v8 }
0x10af   :  { %2210 = vst [vmem:[#allocation14 + $0x10] sm:$0xff] %v2206_v26  ;;  %v2207_v37 = vadd.f32 %v2201_v28, %v3405_v54 }
0x10b1   :  { %2211 = vst [vmem:[#allocation14 + $0x18] sm:$0xff] %v2207_v37 }
0x10b2   :  { %2931 = shalt.err (!%p2928_p4)
}
0x10b3   :  { %s2932_s6 = scalar_lea.hbm %s3474_s9, 512 }
0x10b4   :  { %p2933_p5 = scmp.ne.s32.totalorder %s3474_s9, %s2932_s6  ;;  %p2936_p6 = scmp.lt.u32.totalorder %s2932_s6, %s3474_s9 }
0x10b6   :  { %p2938_p7 = pnand %p2936_p6, %p2933_p5 }
0x10b8   :  { %2941 = shalt.err (!%p2938_p7)
}
0x10b9   :  { %2223 = dma.vmem_to_hbm [thread:$0]  %s2218_s10, 512, %s3474_s9, [#allocation4], %s2954_s21, %s2954_s21, %s2955_s22  }
0x10ba   :  { %2950 = dma.done.wait [#allocation4], 512  }
0x10bb   :  { %2951 = vsyncadd [#allocation4], 4294966784 }
0x10bc   :  { %2227 = vsyncpa [#allocation3], 1 }
0x10bd   :  { %2228 = vsyncpa [#allocation6], 1 }
0x10be   :  { %2229 = vsyncpa [#allocation9], 1 }
0x10bf   :  { %2230 = vsyncpa [#allocation12], 1 }
0x10c0   :  { %2231 = vsyncpa [#allocation4], 1 }

</bundles_post_ra>
